<compile_context>
chip_gen: v6e
topology: v6e:2x2x1
jax: 0.10.0
libtpu: 0.0.40
codegen_flags: <defaults>
</compile_context>

<pallas_src>
import functools

import jax
import jax.numpy as jnp
from jax.experimental import pallas as pl
from jax.experimental.pallas import tpu as pltpu


_NEG_BIG = -1e30  # finite "-inf" for padded action lanes (keeps log_softmax exact)


def _round_up(x, m):
    return ((x + m - 1) // m) * m


@functools.lru_cache(maxsize=1)
def _tensorcores_per_device():
    """TensorCores one pallas_call can shard over via dimension_semantics."""
    try:
        kind = jax.devices()[0].device_kind.lower()
    except Exception:  # pragma: no cover - defensive; assume single core
        return 1
    # v4 / v5p (megacore) and v7x expose 2 TensorCores per device; v5e/v6e have 1.
    if "v4" in kind or "v5p" in kind or "7" in kind:
        return 2
    return 1


def _actor_kernel(x_ref, w1_ref, b1_ref, w2_ref, b2_ref, w3_ref, b3_ref,
                  logits_ref, logp_ref):
    # Layer 1: Linear + ReLU (MXU matmul, f32 accumulation).
    h = jnp.dot(x_ref[...], w1_ref[...], preferred_element_type=jnp.float32)
    h = jnp.maximum(h + b1_ref[...], 0.0)

    # Layer 2: Linear + ReLU.
    h = jnp.dot(h, w2_ref[...], preferred_element_type=jnp.float32)
    h = jnp.maximum(h + b2_ref[...], 0.0)

    # Output layer: Linear -> logits.  w3/b3 are lane-padded to a multiple of 128;
    # padded lanes carry bias = -1e30 so they contribute nothing to the softmax and
    # both stores below are full-lane (unmasked) vst.
    logits = jnp.dot(h, w3_ref[...], preferred_element_type=jnp.float32)
    logits = logits + b3_ref[...]
    logits_ref[...] = logits.astype(logits_ref.dtype)

    # Fused log_softmax epilogue (what sample() consumes).  exp/log run on the EUP
    # and max/sub on the VPU — free filler under the MXU / DMA critical path.
    m = jnp.max(logits, axis=-1, keepdims=True)
    z = logits - m
    lse = jnp.log(jnp.sum(jnp.exp(z), axis=-1, keepdims=True))
    logp_ref[...] = (z - lse).astype(logp_ref.dtype)


@functools.partial(jax.jit, static_argnames=("block_b",))
def actor_forward(state, params, *, block_b=1024):
    """Returns (logits, log_probs) = actor(state) from a single fused Pallas kernel.

    state: (B, n_obs) float32
    params: dict with w1 (n_obs,h1), b1 (1,h1), w2 (h1,h2), b2 (1,h2),
            w3 (h2,n_actions), b3 (1,n_actions)   [W stored (in, out), i.e. y = x@W+b]
    """
    if block_b % 8 != 0:
        raise ValueError(f"block_b must be a multiple of 8, got {block_b}")

    w1, b1 = params["w1"], params["b1"]
    w2, b2 = params["w2"], params["b2"]
    w3, b3 = params["w3"], params["b3"]

    B, n_obs = state.shape
    h1 = w1.shape[1]
    h2 = w2.shape[1]
    n_actions = w3.shape[1]

    # Lane-dense outputs: pad the action dim to a multiple of 128 lanes so the
    # logits / log_prob stores are unmasked (biggest measured store-path lever).
    na_pad = _round_up(max(n_actions, 128), 128)
    if na_pad != n_actions:
        w3 = jnp.pad(w3, ((0, 0), (0, na_pad - n_actions)))
        b3 = jnp.pad(b3, ((0, 0), (0, na_pad - n_actions)),
                     constant_values=_NEG_BIG)

    # Batch-tile selection (see header).  Tiny batches / single-TC chips collapse
    # to a single grid step (the overhead floor); dual-TC chips get >= 2 steps so
    # "parallel" actually uses both TensorCores; large B is capped at block_b.
    n_tc = _tensorcores_per_device()
    if B <= 64 or n_tc <= 1:
        bt = _round_up(B, 8)
    else:
        bt = _round_up(pl.cdiv(B, n_tc), 8)
    bt = min(bt, block_b)
    bp = _round_up(B, bt)
    if bp != B:
        state = jnp.pad(state, ((0, bp - B), (0, 0)))

    grid = (bp // bt,)

    x_spec = pl.BlockSpec((bt, n_obs), lambda i: (i, 0))
    out_spec = pl.BlockSpec((bt, na_pad), lambda i: (i, 0))

    def resident(arr):
        # Full-array block with a constant block index: DMA'd to VMEM once and
        # reused across every grid step (no per-step weight re-DMA).  The six
        # tensors total ~0.3 MiB, so default double-buffering of them is noise;
        # single-buffering via pipeline_mode=pl.Buffered(1) is deliberately
        # skipped to avoid a jax-version dependency for a negligible win.
        return pl.BlockSpec(arr.shape, lambda i: (0, 0))

    flops = 2 * bp * (n_obs * h1 + h1 * h2 + h2 * na_pad)
    transcendentals = bp * (na_pad + 1)  # exp per lane + log per row
    bytes_accessed = 4 * (bp * n_obs                       # state in
                          + w1.size + b1.size + w2.size + b2.size
                          + w3.size + b3.size               # resident params
                          + 2 * bp * na_pad)                # logits + log_probs out
    cost = pl.CostEstimate(flops=flops, transcendentals=transcendentals,
                           bytes_accessed=bytes_accessed)

    logits, logp = pl.pallas_call(
        _actor_kernel,
        out_shape=(jax.ShapeDtypeStruct((bp, na_pad), jnp.float32),
                   jax.ShapeDtypeStruct((bp, na_pad), jnp.float32)),
        grid=grid,
        in_specs=[
            x_spec,
            resident(w1), resident(b1),
            resident(w2), resident(b2),
            resident(w3), resident(b3),
        ],
        out_specs=(out_spec, out_spec),
        compiler_params=pltpu.CompilerParams(
            # Shard batch steps across TensorCores where >1 exists (v7x / megacore);
            # no vmem_limit_bytes override — footprint is tiny, keep compiler headroom.
            dimension_semantics=("parallel",),
        ),
        cost_estimate=cost,
    )(state, w1, b1, w2, b2, w3, b3)

    # Padded batch rows / padded action lanes are sliced off here; do not consume
    # the unsliced kernel outputs.
    return logits[:B, :n_actions], logp[:B, :n_actions]


def init_params(key, n_observations, n_actions, hidden_dims=(256, 256)):
    """Deterministic PyTorch-style (uniform +/- 1/sqrt(fan_in)) init."""
    params = {}
    dims = [n_observations, *hidden_dims, n_actions]
    keys = jax.random.split(key, 2 * (len(dims) - 1))
    for i in range(len(dims) - 1):
        fan_in, fan_out = dims[i], dims[i + 1]
        bound = 1.0 / jnp.sqrt(jnp.float32(fan_in))
        w = jax.random.uniform(keys[2 * i], (fan_in, fan_out),
                               minval=-bound, maxval=bound, dtype=jnp.float32)
        b = jax.random.uniform(keys[2 * i + 1], (1, fan_out),
                               minval=-bound, maxval=bound, dtype=jnp.float32)
        params[f"w{i + 1}"] = w
        params[f"b{i + 1}"] = b
    return params


def reference_forward(state, params):
    h = jnp.maximum(state @ params["w1"] + params["b1"], 0.0)
    h = jnp.maximum(h @ params["w2"] + params["b2"], 0.0)
    logits = h @ params["w3"] + params["b3"]
    return logits, jax.nn.log_softmax(logits, axis=-1)


if __name__ == "__main__":
    # Module-consistent shapes: n_observations=16, n_actions=8, hidden=(256, 256)
    # (the PyTorch default).  batch=200 exercises the padded multi/single-step grid
    # (2 steps on dual-TC chips, 1 on v5e/v6e); batch=24 exercises the tiny-batch
    # single-step floor.  Both go through the lane-padded (8 -> 128) output path.
    key = jax.random.PRNGKey(0)
    k_param, k_state = jax.random.split(key)

    n_observations, n_actions = 16, 8
    hidden_dims = (256, 256)

    params = init_params(k_param, n_observations, n_actions, hidden_dims)

    ok = True
    for batch in (200, 24):
        state = jax.random.normal(
            jax.random.fold_in(k_state, batch), (batch, n_observations),
            dtype=jnp.float32)

        logits, log_probs = actor_forward(state, params)
        logits = jax.block_until_ready(logits)
        log_probs = jax.block_until_ready(log_probs)

        ref_logits, ref_logp = reference_forward(state, params)
        assert logits.shape == (batch, n_actions)
        assert log_probs.shape == (batch, n_actions)
        ok &= bool(jnp.allclose(logits, ref_logits, atol=1e-5, rtol=1e-5))
        ok &= bool(jnp.allclose(log_probs, ref_logp, atol=1e-5, rtol=1e-5))

    assert ok, "Pallas kernel does not match the pure-JAX reference"
    print("KERNEL_OK")
</pallas_src>

<mosaic_0001>
module attributes {stable_mosaic.version = 11 : i64} {
  func.func @_actor_kernel(%arg0: i32, %arg1: memref<200x16xf32, #tpu.memory_space<vmem>>, %arg2: memref<16x256xf32, #tpu.memory_space<vmem>>, %arg3: memref<1x256xf32, #tpu.memory_space<vmem>>, %arg4: memref<256x256xf32, #tpu.memory_space<vmem>>, %arg5: memref<1x256xf32, #tpu.memory_space<vmem>>, %arg6: memref<256x128xf32, #tpu.memory_space<vmem>>, %arg7: memref<1x128xf32, #tpu.memory_space<vmem>>, %arg8: memref<200x128xf32, #tpu.memory_space<vmem>>, %arg9: memref<200x128xf32, #tpu.memory_space<vmem>>) attributes {dimension_semantics = [#tpu.dimension_semantics<parallel>], iteration_bounds = array<i64: 1>, scalar_prefetch = 0 : i64, scratch_operands = 0 : i64, tpu.core_type = #tpu.core_type<tc>, window_params = [{transform_indices = @transform_0, window_bounds = array<i64: 200, 16>}, {pipeline_mode = #tpu.pipeline_mode<synchronous>, transform_indices = @transform_1, window_bounds = array<i64: 16, 256>}, {pipeline_mode = #tpu.pipeline_mode<synchronous>, transform_indices = @transform_2, window_bounds = array<i64: 1, 256>}, {pipeline_mode = #tpu.pipeline_mode<synchronous>, transform_indices = @transform_3, window_bounds = array<i64: 256, 256>}, {pipeline_mode = #tpu.pipeline_mode<synchronous>, transform_indices = @transform_4, window_bounds = array<i64: 1, 256>}, {pipeline_mode = #tpu.pipeline_mode<synchronous>, transform_indices = @transform_5, window_bounds = array<i64: 256, 128>}, {pipeline_mode = #tpu.pipeline_mode<synchronous>, transform_indices = @transform_6, window_bounds = array<i64: 1, 128>}, {transform_indices = @transform_7, window_bounds = array<i64: 200, 128>}, {transform_indices = @transform_8, window_bounds = array<i64: 200, 128>}]} {
    %c0 = arith.constant 0 : index
    %c0_0 = arith.constant 0 : index
    %0 = vector.load %arg1[%c0, %c0_0] : memref<200x16xf32, #tpu.memory_space<vmem>>, vector<200x16xf32>
    %c0_1 = arith.constant 0 : index
    %c0_2 = arith.constant 0 : index
    %1 = vector.load %arg2[%c0_1, %c0_2] : memref<16x256xf32, #tpu.memory_space<vmem>>, vector<16x256xf32>
    %cst = arith.constant dense<0.000000e+00> : vector<200x256xf32>
    %2 = tpu.matmul %0, %1, %cst {dimension_numbers = #tpu.dot_dimension_numbers<[1], [0], [0], [1], [0, 0, 1, 1], [], []>} : vector<200x16xf32>, vector<16x256xf32>, vector<200x256xf32> -> vector<200x256xf32>
    %c0_3 = arith.constant 0 : index
    %c0_4 = arith.constant 0 : index
    %3 = vector.load %arg3[%c0_3, %c0_4] : memref<1x256xf32, #tpu.memory_space<vmem>>, vector<1x256xf32>
    %4 = vector.broadcast %3 : vector<1x256xf32> to vector<200x256xf32>
    %5 = arith.addf %2, %4 : vector<200x256xf32>
    %cst_5 = arith.constant 0.000000e+00 : f32
    %6 = vector.broadcast %cst_5 : f32 to vector<200x256xf32>
    %7 = arith.maximumf %5, %6 : vector<200x256xf32>
    %c0_6 = arith.constant 0 : index
    %c0_7 = arith.constant 0 : index
    %8 = vector.load %arg4[%c0_6, %c0_7] : memref<256x256xf32, #tpu.memory_space<vmem>>, vector<256x256xf32>
    %cst_8 = arith.constant dense<0.000000e+00> : vector<200x256xf32>
    %9 = tpu.matmul %7, %8, %cst_8 {dimension_numbers = #tpu.dot_dimension_numbers<[1], [0], [0], [1], [0, 0, 1, 1], [], []>} : vector<200x256xf32>, vector<256x256xf32>, vector<200x256xf32> -> vector<200x256xf32>
    %c0_9 = arith.constant 0 : index
    %c0_10 = arith.constant 0 : index
    %10 = vector.load %arg5[%c0_9, %c0_10] : memref<1x256xf32, #tpu.memory_space<vmem>>, vector<1x256xf32>
    %11 = vector.broadcast %10 : vector<1x256xf32> to vector<200x256xf32>
    %12 = arith.addf %9, %11 : vector<200x256xf32>
    %cst_11 = arith.constant 0.000000e+00 : f32
    %13 = vector.broadcast %cst_11 : f32 to vector<200x256xf32>
    %14 = arith.maximumf %12, %13 : vector<200x256xf32>
    %c0_12 = arith.constant 0 : index
    %c0_13 = arith.constant 0 : index
    %15 = vector.load %arg6[%c0_12, %c0_13] : memref<256x128xf32, #tpu.memory_space<vmem>>, vector<256x128xf32>
    %cst_14 = arith.constant dense<0.000000e+00> : vector<200x128xf32>
    %16 = tpu.matmul %14, %15, %cst_14 {dimension_numbers = #tpu.dot_dimension_numbers<[1], [0], [0], [1], [0, 0, 1, 1], [], []>} : vector<200x256xf32>, vector<256x128xf32>, vector<200x128xf32> -> vector<200x128xf32>
    %c0_15 = arith.constant 0 : index
    %c0_16 = arith.constant 0 : index
    %17 = vector.load %arg7[%c0_15, %c0_16] : memref<1x128xf32, #tpu.memory_space<vmem>>, vector<1x128xf32>
    %18 = vector.broadcast %17 : vector<1x128xf32> to vector<200x128xf32>
    %19 = arith.addf %16, %18 : vector<200x128xf32>
    %c0_17 = arith.constant 0 : index
    %c0_18 = arith.constant 0 : index
    %20 = vector.load %arg8[%c0_17, %c0_18] : memref<200x128xf32, #tpu.memory_space<vmem>>, vector<200x128xf32>
    tpu.vector_store %arg8[%c0_17, %c0_18], %19 {strides = array<i32>} : memref<200x128xf32, #tpu.memory_space<vmem>>, vector<200x128xf32>,
    %cst_19 = arith.constant dense<0xFF800000> : vector<200xf32>
    %21 = vector.multi_reduction <maximumf>, %19, %cst_19 [1] : vector<200x128xf32> to vector<200xf32>
    %22 = vector.shape_cast %21 : vector<200xf32> to vector<200x1xf32>
    %23 = vector.broadcast %22 : vector<200x1xf32> to vector<200x128xf32>
    %24 = arith.subf %19, %23 : vector<200x128xf32>
    %25 = math.exp %24 : vector<200x128xf32>
    %cst_20 = arith.constant dense<0.000000e+00> : vector<200xf32>
    %26 = vector.multi_reduction <add>, %25, %cst_20 [1] : vector<200x128xf32> to vector<200xf32>
    %27 = vector.shape_cast %26 : vector<200xf32> to vector<200x1xf32>
    %28 = math.log %27 : vector<200x1xf32>
    %29 = vector.broadcast %28 : vector<200x1xf32> to vector<200x128xf32>
    %30 = arith.subf %24, %29 : vector<200x128xf32>
    %c0_21 = arith.constant 0 : index
    %c0_22 = arith.constant 0 : index
    %31 = vector.load %arg9[%c0_21, %c0_22] : memref<200x128xf32, #tpu.memory_space<vmem>>, vector<200x128xf32>
    tpu.vector_store %arg9[%c0_21, %c0_22], %30 {strides = array<i32>} : memref<200x128xf32, #tpu.memory_space<vmem>>, vector<200x128xf32>,
    return
  }
  func.func @transform_0(%arg0: i32) -> (i32, i32) {
    %c0_i32 = arith.constant 0 : i32
    %c0_i32_0 = arith.constant 0 : i32
    return %arg0, %c0_i32 : i32, i32
  }
  func.func @transform_1(%arg0: i32) -> (i32, i32) {
    %c0_i32 = arith.constant 0 : i32
    %c0_i32_0 = arith.constant 0 : i32
    %c0_i32_1 = arith.constant 0 : i32
    return %c0_i32, %c0_i32_0 : i32, i32
  }
  func.func @transform_2(%arg0: i32) -> (i32, i32) {
    %c0_i32 = arith.constant 0 : i32
    %c0_i32_0 = arith.constant 0 : i32
    %c0_i32_1 = arith.constant 0 : i32
    return %c0_i32, %c0_i32_0 : i32, i32
  }
  func.func @transform_3(%arg0: i32) -> (i32, i32) {
    %c0_i32 = arith.constant 0 : i32
    %c0_i32_0 = arith.constant 0 : i32
    %c0_i32_1 = arith.constant 0 : i32
    return %c0_i32, %c0_i32_0 : i32, i32
  }
  func.func @transform_4(%arg0: i32) -> (i32, i32) {
    %c0_i32 = arith.constant 0 : i32
    %c0_i32_0 = arith.constant 0 : i32
    %c0_i32_1 = arith.constant 0 : i32
    return %c0_i32, %c0_i32_0 : i32, i32
  }
  func.func @transform_5(%arg0: i32) -> (i32, i32) {
    %c0_i32 = arith.constant 0 : i32
    %c0_i32_0 = arith.constant 0 : i32
    %c0_i32_1 = arith.constant 0 : i32
    return %c0_i32, %c0_i32_0 : i32, i32
  }
  func.func @transform_6(%arg0: i32) -> (i32, i32) {
    %c0_i32 = arith.constant 0 : i32
    %c0_i32_0 = arith.constant 0 : i32
    %c0_i32_1 = arith.constant 0 : i32
    return %c0_i32, %c0_i32_0 : i32, i32
  }
  func.func @transform_7(%arg0: i32) -> (i32, i32) {
    %c0_i32 = arith.constant 0 : i32
    %c0_i32_0 = arith.constant 0 : i32
    return %arg0, %c0_i32 : i32, i32
  }
  func.func @transform_8(%arg0: i32) -> (i32, i32) {
    %c0_i32 = arith.constant 0 : i32
    %c0_i32_0 = arith.constant 0 : i32
    return %arg0, %c0_i32 : i32, i32
  }
}

</mosaic_0001>

<bundles_post_ra>
// kernel: actor_forward.1
= control target key start
LH: loop header
LB: loop body
LE: loop exit
PB: predicated region body
PF: predicated region fallthrough
CT: control target
= control target key end

     0   :  { %v1419_v3 = vmov 0.0   ;;  %vm69_vm0 = vcmask 130048   ;;  %s2474_s1 = inlined_call_operand.vmem [shape: f32[16,256], index: 1, kind: input, shape index: {}]   ;;  %s2475_s0 = inlined_call_operand.vmem [shape: f32[200,16], index: 0, kind: input, shape index: {}]   ;;  %s2476_s3 = inlined_call_operand.vmem [shape: f32[256,256], index: 3, kind: input, shape index: {}]   ;;  %s2477_s5 = inlined_call_operand.vmem [shape: f32[256,128], index: 5, kind: input, shape index: {}]   ;;  %s2478_s2 = inlined_call_operand.vmem [shape: f32[1,256], index: 2, kind: input, shape index: {}]   ;;  %s2479_s4 = inlined_call_operand.vmem [shape: f32[1,256], index: 4, kind: input, shape index: {}]   ;;  %s2480_s6 = inlined_call_operand.vmem [shape: f32[1,128], index: 6, kind: input, shape index: {}]   ;;  %s2481_s7 = inlined_call_operand.vmem [shape: f32[200,128], index: 7, kind: output, shape index: {0}]   ;;  %s2482_s8 = inlined_call_operand.vmem [shape: f32[200,128], index: 8, kind: output, shape index: {1}]  }
   0x1   :  { %v56_v0 = vld [vmem:[%s2474_s1 + $0x18] sm:$0xff]  ;;  %v55_v1 = vld [vmem:[%s2474_s1 + $0x10] sm:$0xff]  ;;  %v54_v2 = vld [vmem:[%s2474_s1 + $0x8] sm:$0xff]  ;;  %209 = vmatprep.mubr.f32.mxu0 %v1419_v3  ;;  %305 = vmatprep.mubr.f32.mxu1 %v1419_v3 }
   0x2   :  { %173 = vmatprep.subr.mxu0 %v56_v0  ;;  %v53_v4 = vld [vmem:[%s2474_s1] sm:$0xff]  ;;  %1314 = vmatprep.subr.mxu1 %v56_v0  ;;  %v29_v6 = vld [vmem:[%s2475_s0 + $0x8] sm:$0xff]  ;;  %v441_v9 = vld [vmem:[%s2476_s3 + $0xf8] sm:$0xff] }
   0x3   :  { %174 = vmatpush1.msra.mxu0 %v55_v1  ;;  %v28_v5 = vld [vmem:[%s2475_s0] sm:$0xff]  ;;  %1316 = vmatpush1.msra.mxu1 %v55_v1  ;;  %v45_v8 = vld [vmem:[%s2475_s0 + $0x88] sm:$0xff]  ;;  %v30_v10 = vld [vmem:[%s2475_s0 + $0x10] sm:$0xff] }
   0x4   :  { %175 = vmatprep.subr.mxu0 %v54_v2  ;;  %1315 = vmatprep.subr.mxu1 %v54_v2  ;;  %v44_v7 = vld [vmem:[%s2475_s0 + $0x80] sm:$0xff]  ;;  %v440_v11 = vld [vmem:[%s2476_s3 + $0xf0] sm:$0xff]  ;;  %v439_v12 = vld [vmem:[%s2476_s3 + $0xe8] sm:$0xff] }
   0x5   :  { %176 = vmatpush1.msra.mxu0 %v53_v4  ;;  %1317 = vmatpush1.msra.mxu1 %v53_v4  ;;  %v438_v13 = vld [vmem:[%s2476_s3 + $0xe0] sm:$0xff]  ;;  %v46_v14 = vld [vmem:[%s2475_s0 + $0x90] sm:$0xff]  ;;  %v437_v15 = vld [vmem:[%s2476_s3 + $0xd8] sm:$0xff] }
   0x6   :  { %1288 = vmatmul.mubr.msk.f32.vlgmr.msra.gmra.mxu0 %vm69_vm0, %v28_v5  ;;  %790 = vmatprep.subr.mxu0 %v1419_v3  ;;  %v436_v16 = vld [vmem:[%s2476_s3 + $0xd0] sm:$0xff]  ;;  %v31_v17 = vld [vmem:[%s2475_s0 + $0x18] sm:$0xff]  ;;  %v435_v18 = vld [vmem:[%s2476_s3 + $0xc8] sm:$0xff] }
   0x7   :  { %215 = vmatprep.mubr.f32.mxu0 %v1419_v3  ;;  %1304 = vmatmul.mubr.msk.f32.vlgmr.msra.gmra.mxu1 %vm69_vm0, %v44_v7  ;;  %v434_v19 = vld [vmem:[%s2476_s3 + $0xc0] sm:$0xff]  ;;  %v47_v20 = vld [vmem:[%s2475_s0 + $0x98] sm:$0xff]  ;;  %v432_v22 = vld [vmem:[%s2476_s3 + $0xb0] sm:$0xff] }
   0x8   :  { %311 = vmatprep.mubr.f32.mxu1 %v1419_v3  ;;  %486 = vmatprep.subr.mxu1 %v441_v9  ;;  %v433_v21 = vld [vmem:[%s2476_s3 + $0xb8] sm:$0xff]  ;;  %v32_v23 = vld [vmem:[%s2475_s0 + $0x20] sm:$0xff]  ;;  %v431_v24 = vld [vmem:[%s2476_s3 + $0xa8] sm:$0xff] }
   0x9   :  { %487 = vmatpush1.msra.mxu1 %v440_v11  ;;  %v430_v25 = vld [vmem:[%s2476_s3 + $0xa0] sm:$0xff]  ;;  %v429_v27 = vld [vmem:[%s2476_s3 + $0x98] sm:$0xff]  ;;  %v428_v28 = vld [vmem:[%s2476_s3 + $0x90] sm:$0xff] }
   0xa   :  { %1289 = vmatmul.mubr.msk.f32.gmra.mxu0 %vm69_vm0, %v29_v6  ;;  %488 = vmatprep.subr.mxu1 %v439_v12  ;;  %v48_v26 = vld [vmem:[%s2475_s0 + $0xa0] sm:$0xff]  ;;  %v33_v29 = vld [vmem:[%s2475_s0 + $0x28] sm:$0xff]  ;;  %v425_v33 = vld [vmem:[%s2476_s3 + $0x78] sm:$0xff] }
   0xb   :  { %221 = vmatprep.mubr.f32.mxu0 %v1419_v3  ;;  %1305 = vmatmul.mubr.msk.f32.gmra.mxu1 %vm69_vm0, %v45_v8  ;;  %v427_v30 = vld [vmem:[%s2476_s3 + $0x88] sm:$0xff]  ;;  %v426_v31 = vld [vmem:[%s2476_s3 + $0x80] sm:$0xff]  ;;  %v424_v34 = vld [vmem:[%s2476_s3 + $0x70] sm:$0xff] }
   0xc   :  { %317 = vmatprep.mubr.f32.mxu1 %v1419_v3  ;;  %489 = vmatpush1.msra.mxu1 %v438_v13  ;;  %v49_v32 = vld [vmem:[%s2475_s0 + $0xa8] sm:$0xff]  ;;  %v34_v35 = vld [vmem:[%s2475_s0 + $0x30] sm:$0xff]  ;;  %v422_v37 = vld [vmem:[%s2476_s3 + $0x60] sm:$0xff] }
   0xd   :  { %490 = vmatprep.subr.mxu1 %v437_v15  ;;  %v423_v36 = vld [vmem:[%s2476_s3 + $0x68] sm:$0xff]  ;;  %v50_v38 = vld [vmem:[%s2475_s0 + $0xb0] sm:$0xff]  ;;  %v421_v39 = vld [vmem:[%s2476_s3 + $0x58] sm:$0xff] }
   0xe   :  { %1290 = vmatmul.mubr.msk.f32.gmra.mxu0 %vm69_vm0, %v30_v10  ;;  %491 = vmatpush1.msra.mxu1 %v436_v16  ;;  %v420_v40 = vld [vmem:[%s2476_s3 + $0x50] sm:$0xff]  ;;  %v35_v41 = vld [vmem:[%s2475_s0 + $0x38] sm:$0xff]  ;;  %v419_v42 = vld [vmem:[%s2476_s3 + $0x48] sm:$0xff] }
   0xf   :  { %227 = vmatprep.mubr.f32.mxu0 %v1419_v3  ;;  %1306 = vmatmul.mubr.msk.f32.gmra.mxu1 %vm69_vm0, %v46_v14  ;;  %v418_v43 = vld [vmem:[%s2476_s3 + $0x40] sm:$0xff]  ;;  %v51_v44 = vld [vmem:[%s2475_s0 + $0xb8] sm:$0xff]  ;;  %v416_v46 = vld [vmem:[%s2476_s3 + $0x30] sm:$0xff] }
  0x10   :  { %323 = vmatprep.mubr.f32.mxu1 %v1419_v3  ;;  %492 = vmatprep.subr.mxu1 %v435_v18  ;;  %v417_v45 = vld [vmem:[%s2476_s3 + $0x38] sm:$0xff]  ;;  %v36_v47 = vld [vmem:[%s2475_s0 + $0x40] sm:$0xff]  ;;  %v415_v48 = vld [vmem:[%s2476_s3 + $0x28] sm:$0xff] }
  0x11   :  { %493 = vmatpush1.msra.mxu1 %v434_v19  ;;  %v414_v49 = vld [vmem:[%s2476_s3 + $0x20] sm:$0xff]  ;;  %v413_v51 = vld [vmem:[%s2476_s3 + $0x18] sm:$0xff]  ;;  %v412_v52 = vld [vmem:[%s2476_s3 + $0x10] sm:$0xff] }
  0x12   :  { %1291 = vmatmul.mubr.msk.f32.gmra.mxu0 %vm69_vm0, %v31_v17  ;;  %494 = vmatprep.subr.mxu1 %v433_v21  ;;  %v52_v50 = vld [vmem:[%s2475_s0 + $0xc0] sm:$0xff]  ;;  %v37_v53 = vld [vmem:[%s2475_s0 + $0x48] sm:$0xff]  ;;  %v473_v56 = vld [vmem:[%s2476_s3 + $0x1f8] sm:$0xff] }
  0x13   :  { %233 = vmatprep.mubr.f32.mxu0 %v1419_v3  ;;  %1307 = vmatmul.mubr.msk.f32.gmra.mxu1 %vm69_vm0, %v47_v20  ;;  %v411_v54 = vld [vmem:[%s2476_s3 + $0x8] sm:$0xff]  ;;  %v410_v55 = vld [vmem:[%s2476_s3] sm:$0xff]  ;;  %v472_v57 = vld [vmem:[%s2476_s3 + $0x1f0] sm:$0xff] }
  0x14   :  { %329 = vmatprep.mubr.f32.mxu1 %v1419_v3  ;;  %495 = vmatpush1.msra.mxu1 %v432_v22  ;;  %v38_v58 = vld [vmem:[%s2475_s0 + $0x50] sm:$0xff]  ;;  %v471_v59 = vld [vmem:[%s2476_s3 + $0x1e8] sm:$0xff]  ;;  %v470_v60 = vld [vmem:[%s2476_s3 + $0x1e0] sm:$0xff] }
  0x15   :  { %496 = vmatprep.subr.mxu1 %v431_v24  ;;  %v469_v61 = vld [vmem:[%s2476_s3 + $0x1d8] sm:$0xff]  ;;  %v468_v62 = vld [vmem:[%s2476_s3 + $0x1d0] sm:$0xff]  ;;  %v467_v0 = vld [vmem:[%s2476_s3 + $0x1c8] sm:$0xff] }
  0x16   :  { %1292 = vmatmul.mubr.msk.f32.gmra.mxu0 %vm69_vm0, %v32_v23  ;;  %497 = vmatpush1.msra.mxu1 %v430_v25  ;;  %v39_v63 = vld [vmem:[%s2475_s0 + $0x58] sm:$0xff]  ;;  %v466_v1 = vld [vmem:[%s2476_s3 + $0x1c0] sm:$0xff]  ;;  %v464_v4 = vld [vmem:[%s2476_s3 + $0x1b0] sm:$0xff] }
  0x17   :  { %239 = vmatprep.mubr.f32.mxu0 %v1419_v3  ;;  %1308 = vmatmul.mubr.msk.f32.gmra.mxu1 %vm69_vm0, %v48_v26  ;;  %v465_v2 = vld [vmem:[%s2476_s3 + $0x1b8] sm:$0xff]  ;;  %v40_v5 = vld [vmem:[%s2475_s0 + $0x60] sm:$0xff]  ;;  %v463_v6 = vld [vmem:[%s2476_s3 + $0x1a8] sm:$0xff] }
  0x18   :  { %498 = vmatprep.subr.mxu1 %v429_v27  ;;  %335 = vmatprep.mubr.f32.mxu1 %v1419_v3  ;;  %v462_v7 = vld [vmem:[%s2476_s3 + $0x1a0] sm:$0xff]  ;;  %v461_v8 = vld [vmem:[%s2476_s3 + $0x198] sm:$0xff]  ;;  %v460_v9 = vld [vmem:[%s2476_s3 + $0x190] sm:$0xff] }
  0x19   :  { %499 = vmatpush1.msra.mxu1 %v428_v28  ;;  %v41_v10 = vld [vmem:[%s2475_s0 + $0x68] sm:$0xff]  ;;  %v458_v12 = vld [vmem:[%s2476_s3 + $0x180] sm:$0xff]  ;;  %v457_v13 = vld [vmem:[%s2476_s3 + $0x178] sm:$0xff] }
  0x1a   :  { %1293 = vmatmul.mubr.msk.f32.gmra.mxu0 %vm69_vm0, %v33_v29  ;;  %500 = vmatprep.subr.mxu1 %v427_v30  ;;  %v459_v11 = vld [vmem:[%s2476_s3 + $0x188] sm:$0xff]  ;;  %v456_v14 = vld [vmem:[%s2476_s3 + $0x170] sm:$0xff]  ;;  %v454_v17 = vld [vmem:[%s2476_s3 + $0x160] sm:$0xff] }
  0x1b   :  { %245 = vmatprep.mubr.f32.mxu0 %v1419_v3  ;;  %501 = vmatpush1.msra.mxu1 %v426_v31  ;;  %v42_v15 = vld [vmem:[%s2475_s0 + $0x70] sm:$0xff]  ;;  %v455_v16 = vld [vmem:[%s2476_s3 + $0x168] sm:$0xff]  ;;  %v453_v18 = vld [vmem:[%s2476_s3 + $0x158] sm:$0xff] }
  0x1c   :  { %1309 = vmatmul.mubr.msk.f32.gmra.mxu1 %vm69_vm0, %v49_v32  ;;  %502 = vmatprep.subr.mxu1 %v425_v33  ;;  %v452_v19 = vld [vmem:[%s2476_s3 + $0x150] sm:$0xff]  ;;  %v43_v20 = vld [vmem:[%s2475_s0 + $0x78] sm:$0xff]  ;;  %v451_v21 = vld [vmem:[%s2476_s3 + $0x148] sm:$0xff] }
  0x1d   :  { %341 = vmatprep.mubr.f32.mxu1 %v1419_v3  ;;  %503 = vmatpush1.msra.mxu1 %v424_v34  ;;  %v450_v22 = vld [vmem:[%s2476_s3 + $0x140] sm:$0xff]  ;;  %v449_v23 = vld [vmem:[%s2476_s3 + $0x138] sm:$0xff]  ;;  %v448_v24 = vld [vmem:[%s2476_s3 + $0x130] sm:$0xff] }
  0x1e   :  { %1294 = vmatmul.mubr.msk.f32.gmra.mxu0 %vm69_vm0, %v34_v35  ;;  %504 = vmatprep.subr.mxu1 %v423_v36  ;;  %v447_v25 = vld [vmem:[%s2476_s3 + $0x128] sm:$0xff]  ;;  %v446_v26 = vld [vmem:[%s2476_s3 + $0x120] sm:$0xff]  ;;  %v445_v27 = vld [vmem:[%s2476_s3 + $0x118] sm:$0xff] }
  0x1f   :  { %251 = vmatprep.mubr.f32.mxu0 %v1419_v3  ;;  %505 = vmatpush1.msra.mxu1 %v422_v37  ;;  %v444_v28 = vld [vmem:[%s2476_s3 + $0x110] sm:$0xff]  ;;  %v443_v29 = vld [vmem:[%s2476_s3 + $0x108] sm:$0xff]  ;;  %v442_v30 = vld [vmem:[%s2476_s3 + $0x100] sm:$0xff]  ;;  %v59_v37 = vlaneseq }
  0x20   :  { %1310 = vmatmul.mubr.msk.f32.gmra.mxu1 %vm69_vm0, %v50_v38  ;;  %506 = vmatprep.subr.mxu1 %v421_v39  ;;  %v766_v31 = vld [vmem:[%s2477_s5 + $0x78] sm:$0xff]  ;;  %v765_v32 = vld [vmem:[%s2477_s5 + $0x70] sm:$0xff]  ;;  %v764_v33 = vld [vmem:[%s2477_s5 + $0x68] sm:$0xff] }
  0x21   :  { %347 = vmatprep.mubr.f32.mxu1 %v1419_v3  ;;  %507 = vmatpush1.msra.mxu1 %v420_v40  ;;  %v763_v34 = vld [vmem:[%s2477_s5 + $0x60] sm:$0xff]  ;;  %v762_v35 = vld [vmem:[%s2477_s5 + $0x58] sm:$0xff]  ;;  %v761_v36 = vld [vmem:[%s2477_s5 + $0x50] sm:$0xff]  ;;  %v1825_v40 = vshrl.u32 %v59_v37, 7 }
  0x22   :  { %1295 = vmatmul.mubr.msk.f32.gmra.mxu0 %vm69_vm0, %v35_v41  ;;  %508 = vmatprep.subr.mxu1 %v419_v42  ;;  %v760_v38 = vld [vmem:[%s2477_s5 + $0x48] sm:$0xff]  ;;  %v759_v39 = vld [vmem:[%s2477_s5 + $0x40] sm:$0xff]  ;;  %v758_v41 = vld [vmem:[%s2477_s5 + $0x38] sm:$0xff] }
  0x23   :  { %257 = vmatprep.mubr.f32.mxu0 %v1419_v3  ;;  %509 = vmatpush1.msra.mxu1 %v418_v43  ;;  %v757_v42 = vld [vmem:[%s2477_s5 + $0x30] sm:$0xff]  ;;  %v61_v43 = vsub.s32 0, %v1825_v40 }
  0x24   :  { %1311 = vmatmul.mubr.msk.f32.gmra.mxu1 %vm69_vm0, %v51_v44  ;;  %510 = vmatprep.subr.mxu1 %v417_v45  ;;  %v57_v44 = vld [vmem:[%s2478_s2] sm:$0x3]  ;;  %v65_v45 = vsub.s32 1, %v1825_v40  ;;  %v773_v37 = vld [vmem:[%s2477_s5 + $0xb0] sm:$0xff] }
  0x25   :  { %353 = vmatprep.mubr.f32.mxu1 %v1419_v3  ;;  %511 = vmatpush1.msra.mxu1 %v416_v46  ;;  %v756_v46 = vld [vmem:[%s2477_s5 + $0x28] sm:$0xff] }
  0x26   :  { %1296 = vmatmul.mubr.msk.f32.gmra.mxu0 %vm69_vm0, %v36_v47  ;;  %512 = vmatprep.subr.mxu1 %v415_v48  ;;  %v755_v47 = vld [vmem:[%s2477_s5 + $0x20] sm:$0xff]  ;;  %v1850_v48 = vrot.slane %v57_v44, %v61_v43 }
  0x27   :  { %263 = vmatprep.mubr.f32.mxu0 %v1419_v3  ;;  %513 = vmatpush1.msra.mxu1 %v414_v49  ;;  %v1854_v49 = vrot.slane %v57_v44, %v65_v45 }
  0x28   :  { %1312 = vmatmul.mubr.msk.f32.gmra.mxu1 %vm69_vm0, %v52_v50  ;;  %514 = vmatprep.subr.mxu1 %v413_v51  ;;  %v754_v50 = vld [vmem:[%s2477_s5 + $0x18] sm:$0xff] }
  0x29   :  { %515 = vmatpush1.msra.mxu1 %v412_v52  ;;  %791 = vmatpush1.msra.mxu0 %v766_v31  ;;  %v753_v52 = vld [vmem:[%s2477_s5 + $0x10] sm:$0xff] }
  0x2a   :  { %1297 = vmatmul.mubr.msk.f32.gmra.mxu0 %vm69_vm0, %v37_v53  ;;  %516 = vmatprep.subr.mxu1 %v411_v54 }
  0x2b   :  { %269 = vmatprep.mubr.f32.mxu0 %v1419_v3  ;;  %517 = vmatpush1.msra.mxu1 %v410_v55 }
  0x2c   :  { %518 = vmatprep.subr.mxu1 %v473_v56  ;;  %792 = vmatprep.subr.mxu0 %v1419_v3  ;;  %v752_v56 = vld [vmem:[%s2477_s5 + $0x8] sm:$0xff] }
  0x2d   :  { %519 = vmatpush2.msra.mxu1 %v472_v57  ;;  %793 = vmatpush1.msra.mxu0 %v765_v32 }
  0x2e   :  { %1298 = vmatmul.mubr.msk.f32.gmra.mxu0 %vm69_vm0, %v38_v58  ;;  %520 = vmatprep.subr.mxu1 %v471_v59  ;;  %v751_v59 = vld [vmem:[%s2477_s5] sm:$0xff] }
  0x2f   :  { %275 = vmatprep.mubr.f32.mxu0 %v1419_v3  ;;  %521 = vmatpush2.msra.mxu1 %v470_v60 }
  0x30   :  { %522 = vmatprep.subr.mxu1 %v469_v61  ;;  %794 = vmatprep.subr.mxu0 %v1419_v3 }
  0x31   :  { %523 = vmatpush2.msra.mxu1 %v468_v62  ;;  %795 = vmatpush1.msra.mxu0 %v764_v33 }
  0x32   :  { %1299 = vmatmul.mubr.msk.f32.gmra.mxu0 %vm69_vm0, %v39_v63  ;;  %524 = vmatprep.subr.mxu1 %v467_v0  ;;  %v782_v0 = vld [vmem:[%s2477_s5 + $0xf8] sm:$0xff] }
  0x33   :  { %281 = vmatprep.mubr.f32.mxu0 %v1419_v3  ;;  %525 = vmatpush2.msra.mxu1 %v466_v1 }
  0x34   :  { %526 = vmatprep.subr.mxu1 %v465_v2  ;;  %796 = vmatprep.subr.mxu0 %v1419_v3 }
  0x35   :  { %527 = vmatpush2.msra.mxu1 %v464_v4  ;;  %797 = vmatpush1.msra.mxu0 %v763_v34  ;;  %v781_v4 = vld [vmem:[%s2477_s5 + $0xf0] sm:$0xff]  ;;  %v774_v34 = vld [vmem:[%s2477_s5 + $0xb8] sm:$0xff] }
  0x36   :  { %1300 = vmatmul.mubr.msk.f32.gmra.mxu0 %vm69_vm0, %v40_v5  ;;  %528 = vmatprep.subr.mxu1 %v463_v6 }
  0x37   :  { %287 = vmatprep.mubr.f32.mxu0 %v1419_v3  ;;  %529 = vmatpush2.msra.mxu1 %v462_v7 }
  0x38   :  { %530 = vmatprep.subr.mxu1 %v461_v8  ;;  %798 = vmatprep.subr.mxu0 %v1419_v3 }
  0x39   :  { %531 = vmatpush2.msra.mxu1 %v460_v9  ;;  %799 = vmatpush1.msra.mxu0 %v762_v35  ;;  %v780_v9 = vld [vmem:[%s2477_s5 + $0xe8] sm:$0xff] }
  0x3a   :  { %1301 = vmatmul.mubr.msk.f32.gmra.mxu0 %vm69_vm0, %v41_v10  ;;  %532 = vmatprep.subr.mxu1 %v459_v11 }
  0x3b   :  { %293 = vmatprep.mubr.f32.mxu0 %v1419_v3  ;;  %533 = vmatpush2.msra.mxu1 %v458_v12  ;;  %v779_v12 = vld [vmem:[%s2477_s5 + $0xe0] sm:$0xff] }
  0x3c   :  { %534 = vmatprep.subr.mxu1 %v457_v13  ;;  %800 = vmatprep.subr.mxu0 %v1419_v3 }
  0x3d   :  { %535 = vmatpush2.msra.mxu1 %v456_v14  ;;  %801 = vmatpush1.msra.mxu0 %v761_v36 }
  0x3e   :  { %1302 = vmatmul.mubr.msk.f32.gmra.mxu0 %vm69_vm0, %v42_v15  ;;  %536 = vmatprep.subr.mxu1 %v455_v16 }
  0x3f   :  { %299 = vmatprep.mubr.f32.mxu0 %v1419_v3  ;;  %537 = vmatpush2.msra.mxu1 %v454_v17  ;;  %v778_v17 = vld [vmem:[%s2477_s5 + $0xd8] sm:$0xff] }
  0x40   :  { %538 = vmatprep.subr.mxu1 %v453_v18  ;;  %802 = vmatprep.subr.mxu0 %v1419_v3 }
  0x41   :  { %539 = vmatpush2.msra.mxu1 %v452_v19  ;;  %803 = vmatpush1.msra.mxu0 %v760_v38 }
  0x42   :  { %1303 = vmatmul.mubr.msk.f32.gmra.mxu0 %vm69_vm0, %v43_v20  ;;  %540 = vmatprep.subr.mxu1 %v451_v21  ;;  %v777_v20 = vld [vmem:[%s2477_s5 + $0xd0] sm:$0xff] }
  0x43   :  { %541 = vmatpush2.msra.mxu1 %v450_v22  ;;  %804 = vmatprep.subr.mxu0 %v1419_v3 }
  0x44   :  { %542 = vmatprep.subr.mxu1 %v449_v23  ;;  %805 = vmatpush1.msra.mxu0 %v759_v39 }
  0x45   :  { %543 = vmatpush2.msra.mxu1 %v448_v24  ;;  %806 = vmatprep.subr.mxu0 %v1419_v3 }
  0x46   :  { %544 = vmatprep.subr.mxu1 %v447_v25  ;;  %807 = vmatpush1.msra.mxu0 %v758_v41  ;;  %v776_v25 = vld [vmem:[%s2477_s5 + $0xc8] sm:$0xff] }
  0x47   :  { %545 = vmatpush2.msra.mxu1 %v446_v26  ;;  %808 = vmatprep.subr.mxu0 %v1419_v3 }
  0x48   :  { %546 = vmatprep.subr.mxu1 %v445_v27  ;;  %809 = vmatpush1.msra.mxu0 %v757_v42 }
  0x49   :  { %547 = vmatpush2.msra.mxu1 %v444_v28  ;;  %810 = vmatprep.subr.mxu0 %v1419_v3  ;;  %v775_v28 = vld [vmem:[%s2477_s5 + $0xc0] sm:$0xff] }
  0x4a   :  { %548 = vmatprep.subr.mxu1 %v443_v29  ;;  %811 = vmatpush1.msra.mxu0 %v756_v46  ;;  %v772_v46 = vld [vmem:[%s2477_s5 + $0xa8] sm:$0xff] }
  0x4b   :  { %549 = vmatpush2.msra.mxu1 %v442_v30  ;;  %812 = vmatprep.subr.mxu0 %v1419_v3 }
  0x4c   :  { %813 = vmatpush1.msra.mxu0 %v755_v47 }
  0x4d   :  { %814 = vmatprep.subr.mxu0 %v1419_v3 }
  0x4e   :  { %815 = vmatpush1.msra.mxu0 %v754_v50 }
  0x4f   :  { %816 = vmatprep.subr.mxu0 %v1419_v3 }
  0x50   :  { %817 = vmatpush1.msra.mxu0 %v753_v52 }
  0x51   :  { %818 = vmatprep.subr.mxu0 %v1419_v3 }
  0x52   :  { %819 = vmatpush1.msra.mxu0 %v752_v56 }
  0x53   :  { %820 = vmatprep.subr.mxu0 %v1419_v3 }
  0x54   :  { %821 = vmatpush1.msra.mxu0 %v751_v59 }
  0x55   :  { %822 = vmatprep.subr.mxu0 %v1419_v3 }
  0x56   :  { %823 = vmatpush2.msra.mxu0 %v782_v0 }
  0x57   :  { %824 = vmatprep.subr.mxu0 %v1419_v3 }
  0x58   :  { %825 = vmatpush2.msra.mxu0 %v781_v4 }
  0x59   :  { %826 = vmatprep.subr.mxu0 %v1419_v3 }
  0x5a   :  { %827 = vmatpush2.msra.mxu0 %v780_v9 }
  0x5b   :  { %828 = vmatprep.subr.mxu0 %v1419_v3 }
  0x5c   :  { %829 = vmatpush2.msra.mxu0 %v779_v12 }
  0x5d   :  { %830 = vmatprep.subr.mxu0 %v1419_v3 }
  0x5e   :  { %831 = vmatpush2.msra.mxu0 %v778_v17 }
  0x5f   :  { %832 = vmatprep.subr.mxu0 %v1419_v3 }
  0x60   :  { %833 = vmatpush2.msra.mxu0 %v777_v20 }
  0x61   :  { %834 = vmatprep.subr.mxu0 %v1419_v3 }
  0x62   :  { %835 = vmatpush2.msra.mxu0 %v776_v25 }
  0x63   :  { %836 = vmatprep.subr.mxu0 %v1419_v3 }
  0x64   :  { %837 = vmatpush2.msra.mxu0 %v775_v28 }
  0x65   :  { %838 = vmatprep.subr.mxu0 %v1419_v3 }
  0x66   :  { %839 = vmatpush2.msra.mxu0 %v774_v34 }
  0x67   :  { %840 = vmatprep.subr.mxu0 %v1419_v3 }
  0x68   :  { %841 = vmatpush2.msra.mxu0 %v773_v37 }
  0x69   :  { %842 = vmatprep.subr.mxu0 %v1419_v3 }
  0x6a   :  { %843 = vmatpush2.msra.mxu0 %v772_v46 }
  0x6b   :  { %844 = vmatprep.subr.mxu0 %v1419_v3 }
  0xc6   :  { %v211_v51 = vpop.f32.mrf.mxu0 }
  0xc7   :  { %v212_v53 = vadd.f32 %v211_v51, %v1850_v48  ;;  %v1915_v32 = vpop.f32.mrf.mxu1  ;;  %v771_v51 = vld [vmem:[%s2477_s5 + $0xa0] sm:$0xff] }
  0xc8   :  { %v213_v54 = vpop.f32.mrf.mxu0  ;;  %845 = vmatpush2.msra.mxu0 %v771_v51 }
  0xc9   :  { %v214_v55 = vadd.f32 %v213_v54, %v1854_v49  ;;  %v360_v60 = vmax.f32 %v212_v53, 0.0  ;;  %v1927_v42 = vpop.f32.mrf.mxu1  ;;  %846 = vmatprep.subr.mxu0 %v1419_v3 }
  0xca   :  { %v217_v57 = vpop.f32.mrf.mxu0 }
  0xcb   :  { %v361_v58 = vmax.f32 %v214_v55, 0.0  ;;  %v218_v61 = vadd.f32 %v217_v57, %v1850_v48  ;;  %v1939_v55 = vpop.f32.mrf.mxu1 }
  0xcc   :  { %v219_v62 = vpop.f32.mrf.mxu0 }
  0xcd   :  { %v220_v63 = vadd.f32 %v219_v62, %v1854_v49  ;;  %550 = vmatprep.mubr.f32.mxu1 %v361_v58  ;;  %v362_v5 = vmax.f32 %v218_v61, 0.0  ;;  %v1945_v62 = vpop.f32.mrf.mxu1 }
  0xce   :  { %v223_v1 = vpop.f32.mrf.mxu0  ;;  %551 = vmatmul.mubr.f32.vlgmr.msra.gmra.mxu1 %v360_v60 }
  0xcf   :  { %v363_v2 = vmax.f32 %v220_v63, 0.0  ;;  %v224_v6 = vadd.f32 %v223_v1, %v1850_v48 }
  0xd0   :  { %v225_v7 = vpop.f32.mrf.mxu0 }
  0xd1   :  { %v226_v8 = vadd.f32 %v225_v7, %v1854_v49  ;;  %556 = vmatprep.mubr.f32.mxu1 %v363_v2  ;;  %v364_v13 = vmax.f32 %v224_v6, 0.0  ;;  %v1949_v6 = vpop.f32.mrf.mxu1 }
  0xd2   :  { %v229_v10 = vpop.f32.mrf.mxu0  ;;  %557 = vmatmul.mubr.f32.gmra.mxu1 %v362_v5 }
  0xd3   :  { %v365_v11 = vmax.f32 %v226_v8, 0.0  ;;  %v230_v14 = vadd.f32 %v229_v10, %v1850_v48 }
  0xd4   :  { %v231_v15 = vpop.f32.mrf.mxu0 }
  0xd5   :  { %v232_v16 = vadd.f32 %v231_v15, %v1854_v49  ;;  %562 = vmatprep.mubr.f32.mxu1 %v365_v11  ;;  %v366_v21 = vmax.f32 %v230_v14, 0.0 }
  0xd6   :  { %v235_v18 = vpop.f32.mrf.mxu0  ;;  %563 = vmatmul.mubr.f32.gmra.mxu1 %v364_v13  ;;  %v321_v13 = vpop.f32.mrf.mxu1 }
  0xd7   :  { %v367_v19 = vmax.f32 %v232_v16, 0.0  ;;  %v236_v22 = vadd.f32 %v235_v18, %v1850_v48 }
  0xd8   :  { %v237_v23 = vpop.f32.mrf.mxu0  ;;  %v1955_v20 = vpop.f32.mrf.mxu1 }
  0xd9   :  { %v238_v24 = vadd.f32 %v237_v23, %v1854_v49  ;;  %568 = vmatprep.mubr.f32.mxu1 %v367_v19  ;;  %v368_v29 = vmax.f32 %v236_v22, 0.0 }
  0xda   :  { %v241_v26 = vpop.f32.mrf.mxu0  ;;  %569 = vmatmul.mubr.f32.gmra.mxu1 %v366_v21 }
  0xdb   :  { %v369_v27 = vmax.f32 %v238_v24, 0.0  ;;  %v242_v30 = vadd.f32 %v241_v26, %v1850_v48 }
  0xdc   :  { %v243_v31 = vpop.f32.mrf.mxu0 }
  0xdd   :  { %v244_v33 = vadd.f32 %v243_v31, %v1854_v49  ;;  %574 = vmatprep.mubr.f32.mxu1 %v369_v27  ;;  %v370_v38 = vmax.f32 %v242_v30, 0.0  ;;  %v327_v27 = vpop.f32.mrf.mxu1 }
  0xde   :  { %v247_v35 = vpop.f32.mrf.mxu0  ;;  %575 = vmatmul.mubr.f32.gmra.mxu1 %v368_v29 }
  0xdf   :  { %v371_v36 = vmax.f32 %v244_v33, 0.0  ;;  %v248_v39 = vadd.f32 %v247_v35, %v1850_v48  ;;  %v1961_v35 = vpop.f32.mrf.mxu1 }
  0xe0   :  { %v249_v41 = vpop.f32.mrf.mxu0 }
  0xe1   :  { %v250_v44 = vadd.f32 %v249_v41, %v1854_v49  ;;  %580 = vmatprep.mubr.f32.mxu1 %v371_v36  ;;  %v372_v52 = vmax.f32 %v248_v39, 0.0  ;;  %v333_v46 = vpop.f32.mrf.mxu1 }
  0xe2   :  { %v253_v47 = vpop.f32.mrf.mxu0  ;;  %581 = vmatmul.mubr.f32.gmra.mxu1 %v370_v38 }
  0xe3   :  { %v373_v50 = vmax.f32 %v250_v44, 0.0  ;;  %v254_v53 = vadd.f32 %v253_v47, %v1850_v48 }
  0xe4   :  { %v255_v54 = vpop.f32.mrf.mxu0 }
  0xe5   :  { %v256_v56 = vadd.f32 %v255_v54, %v1854_v49  ;;  %586 = vmatprep.mubr.f32.mxu1 %v373_v50  ;;  %v374_v59 = vmax.f32 %v254_v53, 0.0 }
  0xe6   :  { %v259_v57 = vpop.f32.mrf.mxu0  ;;  %587 = vmatmul.mubr.f32.gmra.mxu1 %v372_v52  ;;  %v310_v52 = vadd.f32 %v1927_v42, %v1854_v49 }
  0xe7   :  { %v375_v58 = vmax.f32 %v256_v56, 0.0  ;;  %v260_v60 = vadd.f32 %v259_v57, %v1850_v48  ;;  %v337_v57 = vpop.f32.mrf.mxu1 }
  0xe8   :  { %v261_v61 = vpop.f32.mrf.mxu0 }
  0xe9   :  { %v262_v63 = vadd.f32 %v261_v61, %v1854_v49  ;;  %592 = vmatprep.mubr.f32.mxu1 %v375_v58  ;;  %v376_v2 = vmax.f32 %v260_v60, 0.0  ;;  %v393_v60 = vmax.f32 %v310_v52, 0.0  ;;  %v316_v61 = vadd.f32 %v1945_v62, %v1854_v49  ;;  %v770_v62 = vld [vmem:[%s2477_s5 + $0x98] sm:$0xff] }
  0xea   :  { %v265_v0 = vpop.f32.mrf.mxu0  ;;  %593 = vmatmul.mubr.f32.gmra.mxu1 %v374_v59  ;;  %847 = vmatpush2.msra.mxu0 %v770_v62 }
  0xeb   :  { %v377_v1 = vmax.f32 %v262_v63, 0.0  ;;  %v266_v4 = vadd.f32 %v265_v0, %v1850_v48  ;;  %v308_v0 = vadd.f32 %v1915_v32, %v1850_v48  ;;  %v395_v42 = vmax.f32 %v316_v61, 0.0  ;;  %848 = vmatprep.subr.mxu0 %v1419_v3 }
  0xec   :  { %v267_v5 = vpop.f32.mrf.mxu0  ;;  %v328_v32 = vadd.f32 %v327_v27, %v1854_v49 }
  0xed   :  { %v268_v7 = vadd.f32 %v267_v5, %v1854_v49  ;;  %598 = vmatprep.mubr.f32.mxu1 %v377_v1  ;;  %v378_v10 = vmax.f32 %v266_v4, 0.0  ;;  %v339_v1 = vpop.f32.mrf.mxu1  ;;  %v392_v4 = vmax.f32 %v308_v0, 0.0  ;;  %v314_v5 = vadd.f32 %v1939_v55, %v1850_v48  ;;  %v769_v55 = vld [vmem:[%s2477_s5 + $0x90] sm:$0xff] }
  0xee   :  { %v271_v8 = vpop.f32.mrf.mxu0  ;;  %599 = vmatmul.mubr.f32.gmra.mxu1 %v376_v2  ;;  %v322_v2 = vadd.f32 %v321_v13, %v1854_v49  ;;  %849 = vmatpush2.msra.mxu0 %v769_v55  ;;  %v399_v13 = vmax.f32 %v328_v32, 0.0 }
  0xef   :  { %v379_v9 = vmax.f32 %v268_v7, 0.0  ;;  %v272_v11 = vadd.f32 %v271_v8, %v1850_v48  ;;  %v343_v7 = vpop.f32.mrf.mxu1  ;;  %850 = vmatprep.subr.mxu0 %v1419_v3 }
  0xf0   :  { %v273_v12 = vpop.f32.mrf.mxu0  ;;  %v397_v8 = vmax.f32 %v322_v2, 0.0 }
  0xf1   :  { %v274_v14 = vadd.f32 %v273_v12, %v1854_v49  ;;  %604 = vmatprep.mubr.f32.mxu1 %v379_v9  ;;  %v380_v17 = vmax.f32 %v272_v11, 0.0  ;;  %v394_v9 = vmax.f32 %v314_v5, 0.0  ;;  %v345_v11 = vpop.f32.mrf.mxu1  ;;  %v768_v12 = vld [vmem:[%s2477_s5 + $0x88] sm:$0xff] }
  0xf2   :  { %v277_v15 = vpop.f32.mrf.mxu0  ;;  %605 = vmatmul.mubr.f32.gmra.mxu1 %v378_v10  ;;  %v320_v10 = vadd.f32 %v1949_v6, %v1850_v48  ;;  %851 = vmatpush2.msra.mxu0 %v768_v12 }
  0xf3   :  { %v381_v16 = vmax.f32 %v274_v14, 0.0  ;;  %v278_v18 = vadd.f32 %v277_v15, %v1850_v48  ;;  %v334_v14 = vadd.f32 %v333_v46, %v1854_v49  ;;  %v326_v15 = vadd.f32 %v1955_v20, %v1850_v48  ;;  %852 = vmatprep.subr.mxu0 %v1419_v3 }
  0xf4   :  { %v279_v19 = vpop.f32.mrf.mxu0  ;;  %v396_v6 = vmax.f32 %v320_v10, 0.0  ;;  %v346_v3 = vadd.f32 %v345_v11, %v1854_v49 }
  0xf5   :  { %v280_v21 = vadd.f32 %v279_v19, %v1854_v49  ;;  %610 = vmatprep.mubr.f32.mxu1 %v381_v16  ;;  %v382_v24 = vmax.f32 %v278_v18, 0.0  ;;  %v349_v16 = vpop.f32.mrf.mxu1  ;;  %v401_v18 = vmax.f32 %v334_v14, 0.0  ;;  %v340_v19 = vadd.f32 %v339_v1, %v1854_v49 }
  0xf6   :  { %v283_v22 = vpop.f32.mrf.mxu0  ;;  %611 = vmatmul.mubr.f32.gmra.mxu1 %v380_v17  ;;  %v767_v17 = vld [vmem:[%s2477_s5 + $0x80] sm:$0xff]  ;;  %v405_v27 = vmax.f32 %v346_v3, 0.0 }
  0xf7   :  { %v383_v23 = vmax.f32 %v280_v21, 0.0  ;;  %v284_v25 = vadd.f32 %v283_v22, %v1850_v48  ;;  %853 = vmatpush2.msra.mxu0 %v767_v17  ;;  %v398_v21 = vmax.f32 %v326_v15, 0.0  ;;  %v332_v22 = vadd.f32 %v1961_v35, %v1850_v48 }
  0xf8   :  { %v285_v26 = vpop.f32.mrf.mxu0  ;;  %v403_v20 = vmax.f32 %v340_v19, 0.0 }
  0xf9   :  { %v286_v28 = vadd.f32 %v285_v26, %v1854_v49  ;;  %616 = vmatprep.mubr.f32.mxu1 %v383_v23  ;;  %v384_v31 = vmax.f32 %v284_v25, 0.0  ;;  %v351_v23 = vpop.f32.mrf.mxu1  ;;  %v338_v25 = vadd.f32 %v337_v57, %v1850_v48 }
  0xfa   :  { %v289_v29 = vpop.f32.mrf.mxu0  ;;  %617 = vmatmul.mubr.f32.gmra.mxu1 %v382_v24  ;;  %v400_v24 = vmax.f32 %v332_v22, 0.0 }
  0xfb   :  { %v385_v30 = vmax.f32 %v286_v28, 0.0  ;;  %v290_v33 = vadd.f32 %v289_v29, %v1850_v48  ;;  %v355_v26 = vpop.f32.mrf.mxu1  ;;  %v352_v28 = vadd.f32 %v351_v23, %v1854_v49  ;;  %v402_v29 = vmax.f32 %v338_v25, 0.0 }
  0xfc   :  { %v291_v34 = vpop.f32.mrf.mxu0 }
  0xfd   :  { %v292_v36 = vadd.f32 %v291_v34, %v1854_v49  ;;  %622 = vmatprep.mubr.f32.mxu1 %v385_v30  ;;  %v386_v39 = vmax.f32 %v290_v33, 0.0  ;;  %v344_v30 = vadd.f32 %v343_v7, %v1850_v48  ;;  %v407_v33 = vmax.f32 %v352_v28, 0.0 }
  0xfe   :  { %v295_v37 = vpop.f32.mrf.mxu0  ;;  %623 = vmatmul.mubr.f32.gmra.mxu1 %v384_v31  ;;  %v357_v31 = vpop.f32.mrf.mxu1 }
  0xff   :  { %v387_v38 = vmax.f32 %v292_v36, 0.0  ;;  %v296_v41 = vadd.f32 %v295_v37, %v1850_v48  ;;  %v358_v34 = vadd.f32 %v357_v31, %v1854_v49  ;;  %v404_v35 = vmax.f32 %v344_v30, 0.0 }
 0x100   :  { %v297_v44 = vpop.f32.mrf.mxu0  ;;  %v350_v36 = vadd.f32 %v349_v16, %v1850_v48 }
 0x101   :  { %v298_v47 = vadd.f32 %v297_v44, %v1854_v49  ;;  %628 = vmatprep.mubr.f32.mxu1 %v387_v38  ;;  %v388_v53 = vmax.f32 %v296_v41, 0.0  ;;  %v409_v37 = vmax.f32 %v358_v34, 0.0  ;;  %v474_v44 = vld [vmem:[%s2479_s4] sm:$0x3] }
 0x102   :  { %v301_v50 = vpop.f32.mrf.mxu0  ;;  %629 = vmatmul.mubr.f32.gmra.mxu1 %v386_v39  ;;  %v406_v38 = vmax.f32 %v350_v36, 0.0  ;;  %v356_v39 = vadd.f32 %v355_v26, %v1850_v48  ;;  %v2017_v46 = vrot.slane %v474_v44, %v65_v45 }
 0x103   :  { %v389_v51 = vmax.f32 %v298_v47, 0.0  ;;  %v302_v54 = vadd.f32 %v301_v50, %v1850_v48 }
 0x104   :  { %v303_v56 = vpop.f32.mrf.mxu0  ;;  %v408_v41 = vmax.f32 %v356_v39, 0.0 }
 0x105   :  { %v304_v58 = vadd.f32 %v303_v56, %v1854_v49  ;;  %634 = vmatprep.mubr.f32.mxu1 %v389_v51  ;;  %v390_v63 = vmax.f32 %v302_v54, 0.0  ;;  %v2013_v49 = vrot.slane %v474_v44, %v61_v43 }
 0x106   :  { %635 = vmatmul.mubr.f32.gmra.mxu1 %v388_v53 }
 0x107   :  { %v391_v59 = vmax.f32 %v304_v58, 0.0 }
 0x109   :  { %640 = vmatprep.mubr.f32.mxu1 %v391_v59 }
 0x10a   :  { %641 = vmatmul.mubr.f32.gmra.mxu1 %v390_v63 }
 0x10b   :  { %646 = vmatprep.mubr.f32.mxu1 %v393_v60 }
 0x10e   :  { %647 = vmatmul.mubr.f32.gmra.mxu1 %v392_v4 }
 0x10f   :  { %652 = vmatprep.mubr.f32.mxu1 %v395_v42 }
 0x112   :  { %653 = vmatmul.mubr.f32.gmra.mxu1 %v394_v9 }
 0x113   :  { %658 = vmatprep.mubr.f32.mxu1 %v397_v8 }
 0x116   :  { %659 = vmatmul.mubr.f32.gmra.mxu1 %v396_v6 }
 0x117   :  { %664 = vmatprep.mubr.f32.mxu1 %v399_v13 }
 0x11a   :  { %665 = vmatmul.mubr.f32.gmra.mxu1 %v398_v21 }
 0x11b   :  { %670 = vmatprep.mubr.f32.mxu1 %v401_v18 }
 0x11e   :  { %671 = vmatmul.mubr.f32.gmra.mxu1 %v400_v24 }
 0x11f   :  { %676 = vmatprep.mubr.f32.mxu1 %v403_v20 }
 0x122   :  { %677 = vmatmul.mubr.f32.gmra.mxu1 %v402_v29 }
 0x123   :  { %682 = vmatprep.mubr.f32.mxu1 %v405_v27 }
 0x126   :  { %683 = vmatmul.mubr.f32.gmra.mxu1 %v404_v35 }
 0x127   :  { %688 = vmatprep.mubr.f32.mxu1 %v407_v33 }
 0x12a   :  { %689 = vmatmul.mubr.f32.gmra.mxu1 %v406_v38 }
 0x12b   :  { %694 = vmatprep.mubr.f32.mxu1 %v409_v37 }
 0x12e   :  { %695 = vmatmul.mubr.f32.gmra.mxu1 %v408_v41 }
 0x18e   :  { %v552_v47 = vpop.f32.mrf.mxu1 }
 0x18f   :  { %v553_v50 = vadd.f32 %v552_v47, %v2013_v49 }
 0x190   :  { %v554_v48 = vpop.f32.mrf.mxu1 }
 0x191   :  { %v555_v51 = vadd.f32 %v554_v48, %v2017_v46  ;;  %v701_v54 = vmax.f32 %v553_v50, 0.0 }
 0x192   :  { %v558_v52 = vpop.f32.mrf.mxu1 }
 0x193   :  { %v702_v53 = vmax.f32 %v555_v51, 0.0  ;;  %v559_v56 = vadd.f32 %v558_v52, %v2013_v49 }
 0x194   :  { %v560_v57 = vpop.f32.mrf.mxu1 }
 0x195   :  { %v561_v58 = vadd.f32 %v560_v57, %v2017_v46  ;;  %854 = vmatprep.mubr.f32.mxu0 %v702_v53  ;;  %v703_v45 = vmax.f32 %v559_v56, 0.0 }
 0x196   :  { %v564_v43 = vpop.f32.mrf.mxu1  ;;  %855 = vmatmul.mubr.f32.vlgmr.msra.gmra.mxu0 %v701_v54 }
 0x197   :  { %v704_v40 = vmax.f32 %v561_v58, 0.0  ;;  %v565_v59 = vadd.f32 %v564_v43, %v2013_v49 }
 0x198   :  { %v566_v60 = vpop.f32.mrf.mxu1 }
 0x199   :  { %v567_v61 = vadd.f32 %v566_v60, %v2017_v46  ;;  %859 = vmatprep.mubr.f32.mxu0 %v704_v40  ;;  %v705_v1 = vmax.f32 %v565_v59, 0.0 }
 0x19a   :  { %v570_v63 = vpop.f32.mrf.mxu1  ;;  %860 = vmatmul.mubr.f32.gmra.mxu0 %v703_v45 }
 0x19b   :  { %v706_v0 = vmax.f32 %v567_v61, 0.0  ;;  %v571_v42 = vadd.f32 %v570_v63, %v2013_v49 }
 0x19c   :  { %v572_v2 = vpop.f32.mrf.mxu1 }
 0x19d   :  { %v573_v4 = vadd.f32 %v572_v2, %v2017_v46  ;;  %864 = vmatprep.mubr.f32.mxu0 %v706_v0  ;;  %v707_v62 = vmax.f32 %v571_v42, 0.0 }
 0x19e   :  { %v576_v5 = vpop.f32.mrf.mxu1  ;;  %865 = vmatmul.mubr.f32.gmra.mxu0 %v705_v1 }
 0x19f   :  { %v708_v7 = vmax.f32 %v573_v4, 0.0  ;;  %v577_v8 = vadd.f32 %v576_v5, %v2013_v49 }
 0x1a0   :  { %v578_v32 = vpop.f32.mrf.mxu1 }
 0x1a1   :  { %v579_v9 = vadd.f32 %v578_v32, %v2017_v46  ;;  %869 = vmatprep.mubr.f32.mxu0 %v708_v7  ;;  %v709_v55 = vmax.f32 %v577_v8, 0.0 }
 0x1a2   :  { %v582_v10 = vpop.f32.mrf.mxu1  ;;  %870 = vmatmul.mubr.f32.gmra.mxu0 %v707_v62 }
 0x1a3   :  { %v710_v11 = vmax.f32 %v579_v9, 0.0  ;;  %v583_v12 = vadd.f32 %v582_v10, %v2013_v49 }
 0x1a4   :  { %v584_v13 = vpop.f32.mrf.mxu1 }
 0x1a5   :  { %v585_v14 = vadd.f32 %v584_v13, %v2017_v46  ;;  %874 = vmatprep.mubr.f32.mxu0 %v710_v11  ;;  %v711_v16 = vmax.f32 %v583_v12, 0.0 }
 0x1a6   :  { %v588_v6 = vpop.f32.mrf.mxu1  ;;  %875 = vmatmul.mubr.f32.gmra.mxu0 %v709_v55 }
 0x1a7   :  { %v712_v15 = vmax.f32 %v585_v14, 0.0  ;;  %v589_v17 = vadd.f32 %v588_v6, %v2013_v49 }
 0x1a8   :  { %v590_v18 = vpop.f32.mrf.mxu1 }
 0x1a9   :  { %v591_v19 = vadd.f32 %v590_v18, %v2017_v46  ;;  %879 = vmatprep.mubr.f32.mxu0 %v712_v15  ;;  %v713_v23 = vmax.f32 %v589_v17, 0.0 }
 0x1aa   :  { %v594_v21 = vpop.f32.mrf.mxu1  ;;  %880 = vmatmul.mubr.f32.gmra.mxu0 %v711_v16 }
 0x1ab   :  { %v714_v22 = vmax.f32 %v591_v19, 0.0  ;;  %v595_v20 = vadd.f32 %v594_v21, %v2013_v49 }
 0x1ac   :  { %v596_v3 = vpop.f32.mrf.mxu1 }
 0x1ad   :  { %v597_v24 = vadd.f32 %v596_v3, %v2017_v46  ;;  %884 = vmatprep.mubr.f32.mxu0 %v714_v22  ;;  %v715_v27 = vmax.f32 %v595_v20, 0.0 }
 0x1ae   :  { %v600_v25 = vpop.f32.mrf.mxu1  ;;  %885 = vmatmul.mubr.f32.gmra.mxu0 %v713_v23 }
 0x1af   :  { %v716_v26 = vmax.f32 %v597_v24, 0.0  ;;  %v601_v28 = vadd.f32 %v600_v25, %v2013_v49 }
 0x1b0   :  { %v602_v29 = vpop.f32.mrf.mxu1 }
 0x1b1   :  { %v603_v30 = vadd.f32 %v602_v29, %v2017_v46  ;;  %889 = vmatprep.mubr.f32.mxu0 %v716_v26  ;;  %v717_v34 = vmax.f32 %v601_v28, 0.0 }
 0x1b2   :  { %v606_v31 = vpop.f32.mrf.mxu1  ;;  %890 = vmatmul.mubr.f32.gmra.mxu0 %v715_v27 }
 0x1b3   :  { %v718_v33 = vmax.f32 %v603_v30, 0.0  ;;  %v607_v35 = vadd.f32 %v606_v31, %v2013_v49 }
 0x1b4   :  { %v608_v36 = vpop.f32.mrf.mxu1 }
 0x1b5   :  { %v609_v37 = vadd.f32 %v608_v36, %v2017_v46  ;;  %894 = vmatprep.mubr.f32.mxu0 %v718_v33  ;;  %v719_v41 = vmax.f32 %v607_v35, 0.0 }
 0x1b6   :  { %v612_v38 = vpop.f32.mrf.mxu1  ;;  %895 = vmatmul.mubr.f32.gmra.mxu0 %v717_v34 }
 0x1b7   :  { %v720_v39 = vmax.f32 %v609_v37, 0.0  ;;  %v613_v44 = vadd.f32 %v612_v38, %v2013_v49 }
 0x1b8   :  { %v614_v47 = vpop.f32.mrf.mxu1 }
 0x1b9   :  { %v615_v50 = vadd.f32 %v614_v47, %v2017_v46  ;;  %899 = vmatprep.mubr.f32.mxu0 %v720_v39  ;;  %v721_v52 = vmax.f32 %v613_v44, 0.0 }
 0x1ba   :  { %v618_v48 = vpop.f32.mrf.mxu1  ;;  %900 = vmatmul.mubr.f32.gmra.mxu0 %v719_v41 }
 0x1bb   :  { %v722_v51 = vmax.f32 %v615_v50, 0.0  ;;  %v619_v53 = vadd.f32 %v618_v48, %v2013_v49 }
 0x1bc   :  { %v620_v54 = vpop.f32.mrf.mxu1 }
 0x1bd   :  { %v621_v56 = vadd.f32 %v620_v54, %v2017_v46  ;;  %904 = vmatprep.mubr.f32.mxu0 %v722_v51  ;;  %v723_v43 = vmax.f32 %v619_v53, 0.0 }
 0x1be   :  { %v624_v57 = vpop.f32.mrf.mxu1  ;;  %905 = vmatmul.mubr.f32.gmra.mxu0 %v721_v52 }
 0x1bf   :  { %v724_v58 = vmax.f32 %v621_v56, 0.0  ;;  %v625_v40 = vadd.f32 %v624_v57, %v2013_v49 }
 0x1c0   :  { %v626_v45 = vpop.f32.mrf.mxu1 }
 0x1c1   :  { %v627_v59 = vadd.f32 %v626_v45, %v2017_v46  ;;  %909 = vmatprep.mubr.f32.mxu0 %v724_v58  ;;  %v725_v63 = vmax.f32 %v625_v40, 0.0 }
 0x1c2   :  { %v630_v60 = vpop.f32.mrf.mxu1  ;;  %910 = vmatmul.mubr.f32.gmra.mxu0 %v723_v43 }
 0x1c3   :  { %v726_v61 = vmax.f32 %v627_v59, 0.0  ;;  %v631_v0 = vadd.f32 %v630_v60, %v2013_v49 }
 0x1c4   :  { %v632_v1 = vpop.f32.mrf.mxu1 }
 0x1c5   :  { %v633_v42 = vadd.f32 %v632_v1, %v2017_v46  ;;  %914 = vmatprep.mubr.f32.mxu0 %v726_v61  ;;  %v727_v5 = vmax.f32 %v631_v0, 0.0 }
 0x1c6   :  { %v636_v2 = vpop.f32.mrf.mxu1  ;;  %915 = vmatmul.mubr.f32.gmra.mxu0 %v725_v63 }
 0x1c7   :  { %v728_v4 = vmax.f32 %v633_v42, 0.0  ;;  %v637_v7 = vadd.f32 %v636_v2, %v2013_v49 }
 0x1c8   :  { %v638_v62 = vpop.f32.mrf.mxu1 }
 0x1c9   :  { %v639_v8 = vadd.f32 %v638_v62, %v2017_v46  ;;  %919 = vmatprep.mubr.f32.mxu0 %v728_v4  ;;  %v729_v10 = vmax.f32 %v637_v7, 0.0 }
 0x1ca   :  { %v642_v32 = vpop.f32.mrf.mxu1  ;;  %920 = vmatmul.mubr.f32.gmra.mxu0 %v727_v5 }
 0x1cb   :  { %v730_v9 = vmax.f32 %v639_v8, 0.0  ;;  %v643_v11 = vadd.f32 %v642_v32, %v2013_v49  ;;  %v2072_v32 = vld [vmem:[%s2480_s6] ss:$0 sm:$0xff] }
 0x1cc   :  { %v644_v55 = vpop.f32.mrf.mxu1 }
 0x1cd   :  { %v645_v12 = vadd.f32 %v644_v55, %v2017_v46  ;;  %924 = vmatprep.mubr.f32.mxu0 %v730_v9  ;;  %v731_v6 = vmax.f32 %v643_v11, 0.0 }
 0x1ce   :  { %v648_v13 = vpop.f32.mrf.mxu1  ;;  %925 = vmatmul.mubr.f32.gmra.mxu0 %v729_v10 }
 0x1cf   :  { %v732_v14 = vmax.f32 %v645_v12, 0.0  ;;  %v649_v15 = vadd.f32 %v648_v13, %v2013_v49 }
 0x1d0   :  { %v650_v16 = vpop.f32.mrf.mxu1 }
 0x1d1   :  { %v651_v17 = vadd.f32 %v650_v16, %v2017_v46  ;;  %929 = vmatprep.mubr.f32.mxu0 %v732_v14  ;;  %v733_v21 = vmax.f32 %v649_v15, 0.0 }
 0x1d2   :  { %v654_v18 = vpop.f32.mrf.mxu1  ;;  %930 = vmatmul.mubr.f32.gmra.mxu0 %v731_v6 }
 0x1d3   :  { %v734_v19 = vmax.f32 %v651_v17, 0.0  ;;  %v655_v22 = vadd.f32 %v654_v18, %v2013_v49 }
 0x1d4   :  { %v656_v23 = vpop.f32.mrf.mxu1 }
 0x1d5   :  { %v657_v20 = vadd.f32 %v656_v23, %v2017_v46  ;;  %934 = vmatprep.mubr.f32.mxu0 %v734_v19  ;;  %v735_v25 = vmax.f32 %v655_v22, 0.0 }
 0x1d6   :  { %v660_v3 = vpop.f32.mrf.mxu1  ;;  %935 = vmatmul.mubr.f32.gmra.mxu0 %v733_v21 }
 0x1d7   :  { %v736_v24 = vmax.f32 %v657_v20, 0.0  ;;  %v661_v26 = vadd.f32 %v660_v3, %v2013_v49 }
 0x1d8   :  { %v662_v27 = vpop.f32.mrf.mxu1 }
 0x1d9   :  { %v663_v28 = vadd.f32 %v662_v27, %v2017_v46  ;;  %939 = vmatprep.mubr.f32.mxu0 %v736_v24  ;;  %v737_v31 = vmax.f32 %v661_v26, 0.0 }
 0x1da   :  { %v666_v29 = vpop.f32.mrf.mxu1  ;;  %940 = vmatmul.mubr.f32.gmra.mxu0 %v735_v25 }
 0x1db   :  { %v738_v30 = vmax.f32 %v663_v28, 0.0  ;;  %v667_v33 = vadd.f32 %v666_v29, %v2013_v49 }
 0x1dc   :  { %v668_v34 = vpop.f32.mrf.mxu1 }
 0x1dd   :  { %v669_v35 = vadd.f32 %v668_v34, %v2017_v46  ;;  %944 = vmatprep.mubr.f32.mxu0 %v738_v30  ;;  %v739_v38 = vmax.f32 %v667_v33, 0.0 }
 0x1de   :  { %v672_v36 = vpop.f32.mrf.mxu1  ;;  %945 = vmatmul.mubr.f32.gmra.mxu0 %v737_v31 }
 0x1df   :  { %v740_v37 = vmax.f32 %v669_v35, 0.0  ;;  %v673_v39 = vadd.f32 %v672_v36, %v2013_v49 }
 0x1e0   :  { %v674_v41 = vpop.f32.mrf.mxu1 }
 0x1e1   :  { %v675_v44 = vadd.f32 %v674_v41, %v2017_v46  ;;  %949 = vmatprep.mubr.f32.mxu0 %v740_v37  ;;  %v741_v48 = vmax.f32 %v673_v39, 0.0 }
 0x1e2   :  { %v678_v47 = vpop.f32.mrf.mxu1  ;;  %950 = vmatmul.mubr.f32.gmra.mxu0 %v739_v38 }
 0x1e3   :  { %v742_v50 = vmax.f32 %v675_v44, 0.0  ;;  %v679_v51 = vadd.f32 %v678_v47, %v2013_v49 }
 0x1e4   :  { %v680_v52 = vpop.f32.mrf.mxu1 }
 0x1e5   :  { %v681_v53 = vadd.f32 %v680_v52, %v2017_v46  ;;  %954 = vmatprep.mubr.f32.mxu0 %v742_v50  ;;  %v743_v57 = vmax.f32 %v679_v51, 0.0 }
 0x1e6   :  { %v684_v54 = vpop.f32.mrf.mxu1  ;;  %955 = vmatmul.mubr.f32.gmra.mxu0 %v741_v48 }
 0x1e7   :  { %v744_v56 = vmax.f32 %v681_v53, 0.0  ;;  %v685_v58 = vadd.f32 %v684_v54, %v2013_v49 }
 0x1e8   :  { %v686_v43 = vpop.f32.mrf.mxu1 }
 0x1e9   :  { %v687_v40 = vadd.f32 %v686_v43, %v2017_v46  ;;  %959 = vmatprep.mubr.f32.mxu0 %v744_v56  ;;  %v745_v60 = vmax.f32 %v685_v58, 0.0 }
 0x1ea   :  { %v690_v45 = vpop.f32.mrf.mxu1  ;;  %960 = vmatmul.mubr.f32.gmra.mxu0 %v743_v57 }
 0x1eb   :  { %v746_v59 = vmax.f32 %v687_v40, 0.0  ;;  %v691_v61 = vadd.f32 %v690_v45, %v2013_v49 }
 0x1ec   :  { %v692_v63 = vpop.f32.mrf.mxu1 }
 0x1ed   :  { %v693_v0 = vadd.f32 %v692_v63, %v2017_v46  ;;  %964 = vmatprep.mubr.f32.mxu0 %v746_v59  ;;  %v747_v2 = vmax.f32 %v691_v61, 0.0 }
 0x1ee   :  { %v696_v1 = vpop.f32.mrf.mxu1  ;;  %965 = vmatmul.mubr.f32.gmra.mxu0 %v745_v60 }
 0x1ef   :  { %v748_v42 = vmax.f32 %v693_v0, 0.0  ;;  %v697_v4 = vadd.f32 %v696_v1, %v2013_v49 }
 0x1f0   :  { %v698_v5 = vpop.f32.mrf.mxu1 }
 0x1f1   :  { %v699_v7 = vadd.f32 %v698_v5, %v2017_v46  ;;  %969 = vmatprep.mubr.f32.mxu0 %v748_v42  ;;  %v749_v8 = vmax.f32 %v697_v4, 0.0 }
 0x1f2   :  { %970 = vmatmul.mubr.f32.gmra.mxu0 %v747_v2 }
 0x1f3   :  { %v750_v62 = vmax.f32 %v699_v7, 0.0 }
 0x1f5   :  { %974 = vmatprep.mubr.f32.mxu0 %v750_v62 }
 0x1f6   :  { %975 = vmatmul.mubr.f32.gmra.mxu0 %v749_v8 }
 0x256   :  { %v856_v9 = vpop.f32.mrf.mxu0 }
 0x257   :  { %v2075_v10 = vadd.f32 %v2072_v32, %v856_v9 }
 0x258   :  { %v858_v11 = vpop.f32.mrf.mxu0 }
 0x259   :  { %980 = vst [vmem:[%s2481_s7] sm:$0xff] %v2075_v10  ;;  %1005 = vmax.xlane.f32.xlu0 %v2075_v10 }
 0x25a   :  { %v861_v49 = vpop.f32.mrf.mxu0 }
 0x25b   :  { %v2083_v46 = vadd.f32 %v2072_v32, %v861_v49 }
 0x25c   :  { %v863_v55 = vpop.f32.mrf.mxu0 }
 0x25d   :  { %981 = vst [vmem:[%s2481_s7 + $0x8] sm:$0xff] %v2083_v46  ;;  %1007 = vmax.xlane.f32.xlu0 %v2083_v46 }
 0x25e   :  { %v866_v12 = vpop.f32.mrf.mxu0 }
 0x25f   :  { %v2091_v13 = vadd.f32 %v2072_v32, %v866_v12 }
 0x260   :  { %v868_v14 = vpop.f32.mrf.mxu0 }
 0x261   :  { %982 = vst [vmem:[%s2481_s7 + $0x10] sm:$0xff] %v2091_v13  ;;  %1009 = vmax.xlane.f32.xlu1 %v2091_v13 }
 0x262   :  { %v871_v6 = vpop.f32.mrf.mxu0 }
 0x263   :  { %v2099_v15 = vadd.f32 %v2072_v32, %v871_v6 }
 0x264   :  { %v873_v16 = vpop.f32.mrf.mxu0 }
 0x265   :  { %983 = vst [vmem:[%s2481_s7 + $0x18] sm:$0xff] %v2099_v15  ;;  %1011 = vmax.xlane.f32.xlu1 %v2099_v15 }
 0x266   :  { %v876_v17 = vpop.f32.mrf.mxu0 }
 0x267   :  { %v2107_v18 = vadd.f32 %v2072_v32, %v876_v17 }
 0x268   :  { %v878_v19 = vpop.f32.mrf.mxu0 }
 0x269   :  { %984 = vst [vmem:[%s2481_s7 + $0x20] sm:$0xff] %v2107_v18  ;;  %1013 = vmax.xlane.f32.xlu0 %v2107_v18 }
 0x26a   :  { %v881_v21 = vpop.f32.mrf.mxu0 }
 0x26b   :  { %v2115_v22 = vadd.f32 %v2072_v32, %v881_v21 }
 0x26c   :  { %v883_v23 = vpop.f32.mrf.mxu0 }
 0x26d   :  { %985 = vst [vmem:[%s2481_s7 + $0x28] sm:$0xff] %v2115_v22  ;;  %1015 = vmax.xlane.f32.xlu1 %v2115_v22 }
 0x26e   :  { %v886_v20 = vpop.f32.mrf.mxu0 }
 0x26f   :  { %v2123_v3 = vadd.f32 %v2072_v32, %v886_v20 }
 0x270   :  { %v888_v24 = vpop.f32.mrf.mxu0 }
 0x271   :  { %986 = vst [vmem:[%s2481_s7 + $0x30] sm:$0xff] %v2123_v3  ;;  %1017 = vmax.xlane.f32.xlu0 %v2123_v3 }
 0x272   :  { %v891_v25 = vpop.f32.mrf.mxu0 }
 0x273   :  { %v2131_v26 = vadd.f32 %v2072_v32, %v891_v25 }
 0x274   :  { %v893_v27 = vpop.f32.mrf.mxu0 }
 0x275   :  { %987 = vst [vmem:[%s2481_s7 + $0x38] sm:$0xff] %v2131_v26  ;;  %1019 = vmax.xlane.f32.xlu1 %v2131_v26 }
 0x276   :  { %v896_v28 = vpop.f32.mrf.mxu0 }
 0x277   :  { %v2139_v29 = vadd.f32 %v2072_v32, %v896_v28 }
 0x278   :  { %v898_v30 = vpop.f32.mrf.mxu0 }
 0x279   :  { %988 = vst [vmem:[%s2481_s7 + $0x40] sm:$0xff] %v2139_v29  ;;  %1021 = vmax.xlane.f32.xlu0 %v2139_v29 }
 0x27a   :  { %v901_v31 = vpop.f32.mrf.mxu0 }
 0x27b   :  { %v2147_v33 = vadd.f32 %v2072_v32, %v901_v31 }
 0x27c   :  { %v903_v34 = vpop.f32.mrf.mxu0 }
 0x27d   :  { %989 = vst [vmem:[%s2481_s7 + $0x48] sm:$0xff] %v2147_v33  ;;  %1023 = vmax.xlane.f32.xlu1 %v2147_v33 }
 0x27e   :  { %v906_v35 = vpop.f32.mrf.mxu0 }
 0x27f   :  { %v2155_v36 = vadd.f32 %v2072_v32, %v906_v35 }
 0x280   :  { %v908_v37 = vpop.f32.mrf.mxu0 }
 0x281   :  { %990 = vst [vmem:[%s2481_s7 + $0x50] sm:$0xff] %v2155_v36  ;;  %1025 = vmax.xlane.f32.xlu0 %v2155_v36 }
 0x282   :  { %v911_v38 = vpop.f32.mrf.mxu0 }
 0x283   :  { %v2163_v39 = vadd.f32 %v2072_v32, %v911_v38 }
 0x284   :  { %v913_v41 = vpop.f32.mrf.mxu0 }
 0x285   :  { %991 = vst [vmem:[%s2481_s7 + $0x58] sm:$0xff] %v2163_v39  ;;  %1027 = vmax.xlane.f32.xlu1 %v2163_v39 }
 0x286   :  { %v916_v44 = vpop.f32.mrf.mxu0 }
 0x287   :  { %v2171_v47 = vadd.f32 %v2072_v32, %v916_v44 }
 0x288   :  { %v918_v50 = vpop.f32.mrf.mxu0 }
 0x289   :  { %992 = vst [vmem:[%s2481_s7 + $0x60] sm:$0xff] %v2171_v47  ;;  %1029 = vmax.xlane.f32.xlu0 %v2171_v47 }
 0x28a   :  { %v921_v48 = vpop.f32.mrf.mxu0 }
 0x28b   :  { %v2179_v51 = vadd.f32 %v2072_v32, %v921_v48 }
 0x28c   :  { %v923_v52 = vpop.f32.mrf.mxu0 }
 0x28d   :  { %993 = vst [vmem:[%s2481_s7 + $0x68] sm:$0xff] %v2179_v51  ;;  %1031 = vmax.xlane.f32.xlu1 %v2179_v51 }
 0x28e   :  { %v926_v53 = vpop.f32.mrf.mxu0 }
 0x28f   :  { %v2187_v54 = vadd.f32 %v2072_v32, %v926_v53 }
 0x290   :  { %v928_v56 = vpop.f32.mrf.mxu0 }
 0x291   :  { %994 = vst [vmem:[%s2481_s7 + $0x70] sm:$0xff] %v2187_v54  ;;  %1033 = vmax.xlane.f32.xlu0 %v2187_v54 }
 0x292   :  { %v931_v57 = vpop.f32.mrf.mxu0 }
 0x293   :  { %v2195_v58 = vadd.f32 %v2072_v32, %v931_v57 }
 0x294   :  { %v933_v43 = vpop.f32.mrf.mxu0 }
 0x295   :  { %995 = vst [vmem:[%s2481_s7 + $0x78] sm:$0xff] %v2195_v58  ;;  %1035 = vmax.xlane.f32.xlu1 %v2195_v58 }
 0x296   :  { %v936_v40 = vpop.f32.mrf.mxu0 }
 0x297   :  { %v2203_v45 = vadd.f32 %v2072_v32, %v936_v40 }
 0x298   :  { %v938_v59 = vpop.f32.mrf.mxu0 }
 0x299   :  { %996 = vst [vmem:[%s2481_s7 + $0x80] sm:$0xff] %v2203_v45  ;;  %1037 = vmax.xlane.f32.xlu0 %v2203_v45 }
 0x29a   :  { %v941_v60 = vpop.f32.mrf.mxu0 }
 0x29b   :  { %v2211_v61 = vadd.f32 %v2072_v32, %v941_v60 }
 0x29c   :  { %v943_v63 = vpop.f32.mrf.mxu0 }
 0x29d   :  { %997 = vst [vmem:[%s2481_s7 + $0x88] sm:$0xff] %v2211_v61  ;;  %1039 = vmax.xlane.f32.xlu1 %v2211_v61 }
 0x29e   :  { %v946_v0 = vpop.f32.mrf.mxu0 }
 0x29f   :  { %v2219_v1 = vadd.f32 %v2072_v32, %v946_v0 }
 0x2a0   :  { %v948_v42 = vpop.f32.mrf.mxu0 }
 0x2a1   :  { %998 = vst [vmem:[%s2481_s7 + $0x90] sm:$0xff] %v2219_v1  ;;  %1041 = vmax.xlane.f32.xlu0 %v2219_v1 }
 0x2a2   :  { %v951_v2 = vpop.f32.mrf.mxu0 }
 0x2a3   :  { %v2227_v4 = vadd.f32 %v2072_v32, %v951_v2 }
 0x2a4   :  { %v953_v5 = vpop.f32.mrf.mxu0 }
 0x2a5   :  { %999 = vst [vmem:[%s2481_s7 + $0x98] sm:$0xff] %v2227_v4  ;;  %1043 = vmax.xlane.f32.xlu1 %v2227_v4 }
 0x2a6   :  { %v956_v7 = vpop.f32.mrf.mxu0 }
 0x2a7   :  { %v2235_v62 = vadd.f32 %v2072_v32, %v956_v7 }
 0x2a8   :  { %v958_v8 = vpop.f32.mrf.mxu0 }
 0x2a9   :  { %1000 = vst [vmem:[%s2481_s7 + $0xa0] sm:$0xff] %v2235_v62  ;;  %1045 = vmax.xlane.f32.xlu0 %v2235_v62 }
 0x2aa   :  { %v961_v9 = vpop.f32.mrf.mxu0 }
 0x2ab   :  { %v2243_v11 = vadd.f32 %v2072_v32, %v961_v9 }
 0x2ac   :  { %v963_v49 = vpop.f32.mrf.mxu0 }
 0x2ad   :  { %1001 = vst [vmem:[%s2481_s7 + $0xa8] sm:$0xff] %v2243_v11  ;;  %1047 = vmax.xlane.f32.xlu1 %v2243_v11 }
 0x2ae   :  { %v966_v55 = vpop.f32.mrf.mxu0 }
 0x2af   :  { %v2251_v12 = vadd.f32 %v2072_v32, %v966_v55 }
 0x2b0   :  { %v968_v14 = vpop.f32.mrf.mxu0 }
 0x2b1   :  { %1002 = vst [vmem:[%s2481_s7 + $0xb0] sm:$0xff] %v2251_v12  ;;  %1049 = vmax.xlane.f32.xlu0 %v2251_v12 }
 0x2b2   :  { %v971_v6 = vpop.f32.mrf.mxu0 }
 0x2b3   :  { %v2259_v16 = vadd.f32 %v2072_v32, %v971_v6 }
 0x2b4   :  { %v973_v17 = vpop.f32.mrf.mxu0 }
 0x2b5   :  { %1003 = vst [vmem:[%s2481_s7 + $0xb8] sm:$0xff] %v2259_v16  ;;  %1051 = vmax.xlane.f32.xlu1 %v2259_v16 }
 0x2b6   :  { %v976_v19 = vpop.f32.mrf.mxu0 }
 0x2b7   :  { %v2267_v21 = vadd.f32 %v2072_v32, %v976_v19 }
 0x2b8   :  { %v978_v23 = vpop.f32.mrf.mxu0 }
 0x2b9   :  { %1004 = vst [vmem:[%s2481_s7 + $0xc0] sm:$0xff] %v2267_v21  ;;  %1053 = vmax.xlane.f32.xlu0 %v2267_v21 }
 0x2e2   :  { %v1006_v20 = vpop.xlane.xlu0 %1005 }
 0x2e3   :  { %v2275_v24 = vsub.f32 %v2075_v10, %v1006_v20 }
 0x2e5   :  { %v1080_v25 = vmul.f32 1.442695, %v2275_v24 }
 0x2e6   :  { %v1008_v27 = vpop.xlane.xlu0 %1007 }
 0x2e7   :  { %1319 = vpow2.f32 %v1080_v25  ;;  %v2279_v28 = vsub.f32 %v2083_v46, %v1008_v27 }
 0x2e9   :  { %v1082_v32 = vmul.f32 1.442695, %v2279_v28 }
 0x2ea   :  { %v1010_v30 = vpop.xlane.xlu1 %1009 }
 0x2eb   :  { %1321 = vpow2.f32 %v1082_v32  ;;  %v2283_v31 = vsub.f32 %v2091_v13, %v1010_v30 }
 0x2ed   :  { %v1084_v34 = vmul.f32 1.442695, %v2283_v31 }
 0x2ee   :  { %v1012_v35 = vpop.xlane.xlu1 %1011 }
 0x2ef   :  { %1323 = vpow2.f32 %v1084_v34  ;;  %v2287_v10 = vsub.f32 %v2099_v15, %v1012_v35 }
 0x2f1   :  { %v1086_v37 = vmul.f32 1.442695, %v2287_v10 }
 0x2f2   :  { %v1014_v38 = vpop.xlane.xlu0 %1013 }
 0x2f3   :  { %1325 = vpow2.f32 %v1086_v37  ;;  %v2291_v46 = vsub.f32 %v2107_v18, %v1014_v38 }
 0x2f4   :  { %v1320_v41 = vpop.eup %1319 }
 0x2f5   :  { %v1088_v44 = vmul.f32 1.442695, %v2291_v46  ;;  %1130 = vadd.xlane.f32.xlu1 %v1320_v41 }
 0x2f6   :  { %v1016_v13 = vpop.xlane.xlu1 %1015 }
 0x2f7   :  { %1327 = vpow2.f32 %v1088_v44  ;;  %v2295_v50 = vsub.f32 %v2115_v22, %v1016_v13 }
 0x2f8   :  { %v1322_v48 = vpop.eup %1321 }
 0x2f9   :  { %v1090_v15 = vmul.f32 1.442695, %v2295_v50  ;;  %1132 = vadd.xlane.f32.xlu0 %v1322_v48 }
 0x2fa   :  { %v1018_v52 = vpop.xlane.xlu0 %1017 }
 0x2fb   :  { %1329 = vpow2.f32 %v1090_v15  ;;  %v2299_v53 = vsub.f32 %v2123_v3, %v1018_v52 }
 0x2fc   :  { %v1324_v18 = vpop.eup %1323 }
 0x2fd   :  { %v1092_v56 = vmul.f32 1.442695, %v2299_v53  ;;  %1134 = vadd.xlane.f32.xlu1 %v1324_v18 }
 0x2fe   :  { %v1020_v57 = vpop.xlane.xlu1 %1019 }
 0x2ff   :  { %1331 = vpow2.f32 %v1092_v56  ;;  %v2303_v43 = vsub.f32 %v2131_v26, %v1020_v57 }
 0x300   :  { %v1326_v22 = vpop.eup %1325 }
 0x301   :  { %v1094_v40 = vmul.f32 1.442695, %v2303_v43  ;;  %1136 = vadd.xlane.f32.xlu0 %v1326_v22 }
 0x302   :  { %v1022_v59 = vpop.xlane.xlu0 %1021 }
 0x303   :  { %1333 = vpow2.f32 %v1094_v40  ;;  %v2307_v60 = vsub.f32 %v2139_v29, %v1022_v59 }
 0x304   :  { %v1328_v3 = vpop.eup %1327 }
 0x305   :  { %v1096_v63 = vmul.f32 1.442695, %v2307_v60  ;;  %1138 = vadd.xlane.f32.xlu1 %v1328_v3 }
 0x306   :  { %v1024_v0 = vpop.xlane.xlu1 %1023 }
 0x307   :  { %1335 = vpow2.f32 %v1096_v63  ;;  %v2311_v42 = vsub.f32 %v2147_v33, %v1024_v0 }
 0x308   :  { %v1330_v26 = vpop.eup %1329 }
 0x309   :  { %v1098_v2 = vmul.f32 1.442695, %v2311_v42  ;;  %1140 = vadd.xlane.f32.xlu0 %v1330_v26 }
 0x30a   :  { %v1026_v5 = vpop.xlane.xlu0 %1025 }
 0x30b   :  { %1337 = vpow2.f32 %v1098_v2  ;;  %v2315_v7 = vsub.f32 %v2155_v36, %v1026_v5 }
 0x30c   :  { %v1332_v29 = vpop.eup %1331 }
 0x30d   :  { %v1100_v8 = vmul.f32 1.442695, %v2315_v7  ;;  %1142 = vadd.xlane.f32.xlu1 %v1332_v29 }
 0x30e   :  { %v1028_v9 = vpop.xlane.xlu1 %1027 }
 0x30f   :  { %1339 = vpow2.f32 %v1100_v8  ;;  %v2319_v49 = vsub.f32 %v2163_v39, %v1028_v9 }
 0x310   :  { %v1334_v33 = vpop.eup %1333 }
 0x311   :  { %v1102_v55 = vmul.f32 1.442695, %v2319_v49  ;;  %1144 = vadd.xlane.f32.xlu0 %v1334_v33 }
 0x312   :  { %v1030_v14 = vpop.xlane.xlu0 %1029 }
 0x313   :  { %1341 = vpow2.f32 %v1102_v55  ;;  %v2323_v6 = vsub.f32 %v2171_v47, %v1030_v14 }
 0x314   :  { %v1336_v36 = vpop.eup %1335 }
 0x315   :  { %v1104_v17 = vmul.f32 1.442695, %v2323_v6  ;;  %1146 = vadd.xlane.f32.xlu1 %v1336_v36 }
 0x316   :  { %v1032_v19 = vpop.xlane.xlu1 %1031 }
 0x317   :  { %1343 = vpow2.f32 %v1104_v17  ;;  %v2327_v23 = vsub.f32 %v2179_v51, %v1032_v19 }
 0x318   :  { %v1338_v39 = vpop.eup %1337 }
 0x319   :  { %v1106_v20 = vmul.f32 1.442695, %v2327_v23  ;;  %1148 = vadd.xlane.f32.xlu0 %v1338_v39 }
 0x31a   :  { %v1034_v25 = vpop.xlane.xlu0 %1033 }
 0x31b   :  { %1345 = vpow2.f32 %v1106_v20  ;;  %v2331_v27 = vsub.f32 %v2187_v54, %v1034_v25 }
 0x31c   :  { %v1340_v47 = vpop.eup %1339 }
 0x31d   :  { %v1108_v32 = vmul.f32 1.442695, %v2331_v27  ;;  %1150 = vadd.xlane.f32.xlu1 %v1340_v47 }
 0x31e   :  { %v1036_v30 = vpop.xlane.xlu1 %1035 }
 0x31f   :  { %1347 = vpow2.f32 %v1108_v32  ;;  %v2335_v34 = vsub.f32 %v2195_v58, %v1036_v30 }
 0x320   :  { %v1342_v51 = vpop.eup %1341 }
 0x321   :  { %v1110_v35 = vmul.f32 1.442695, %v2335_v34  ;;  %1152 = vadd.xlane.f32.xlu0 %v1342_v51 }
 0x322   :  { %v1038_v37 = vpop.xlane.xlu0 %1037 }
 0x323   :  { %1349 = vpow2.f32 %v1110_v35  ;;  %v2339_v38 = vsub.f32 %v2203_v45, %v1038_v37 }
 0x324   :  { %v1344_v54 = vpop.eup %1343 }
 0x325   :  { %v1112_v41 = vmul.f32 1.442695, %v2339_v38  ;;  %1154 = vadd.xlane.f32.xlu1 %v1344_v54 }
 0x326   :  { %v1040_v44 = vpop.xlane.xlu1 %1039 }
 0x327   :  { %1351 = vpow2.f32 %v1112_v41  ;;  %v2343_v13 = vsub.f32 %v2211_v61, %v1040_v44 }
 0x328   :  { %v1346_v58 = vpop.eup %1345 }
 0x329   :  { %v1114_v48 = vmul.f32 1.442695, %v2343_v13  ;;  %1156 = vadd.xlane.f32.xlu0 %v1346_v58 }
 0x32a   :  { %v1042_v15 = vpop.xlane.xlu0 %1041 }
 0x32b   :  { %1353 = vpow2.f32 %v1114_v48  ;;  %v2347_v52 = vsub.f32 %v2219_v1, %v1042_v15 }
 0x32c   :  { %v1348_v45 = vpop.eup %1347 }
 0x32d   :  { %v1116_v18 = vmul.f32 1.442695, %v2347_v52  ;;  %1158 = vadd.xlane.f32.xlu1 %v1348_v45 }
 0x32e   :  { %v1044_v56 = vpop.xlane.xlu1 %1043 }
 0x32f   :  { %1355 = vpow2.f32 %v1116_v18  ;;  %v2351_v57 = vsub.f32 %v2227_v4, %v1044_v56 }
 0x330   :  { %v1350_v61 = vpop.eup %1349 }
 0x331   :  { %v1118_v22 = vmul.f32 1.442695, %v2351_v57  ;;  %1160 = vadd.xlane.f32.xlu0 %v1350_v61 }
 0x332   :  { %v1046_v40 = vpop.xlane.xlu0 %1045 }
 0x333   :  { %1357 = vpow2.f32 %v1118_v22  ;;  %v2355_v59 = vsub.f32 %v2235_v62, %v1046_v40 }
 0x334   :  { %v1352_v1 = vpop.eup %1351 }
 0x335   :  { %v1120_v3 = vmul.f32 1.442695, %v2355_v59  ;;  %1162 = vadd.xlane.f32.xlu1 %v1352_v1 }
 0x336   :  { %v1048_v63 = vpop.xlane.xlu1 %1047 }
 0x337   :  { %1359 = vpow2.f32 %v1120_v3  ;;  %v2359_v0 = vsub.f32 %v2243_v11, %v1048_v63 }
 0x338   :  { %v1354_v4 = vpop.eup %1353 }
 0x339   :  { %v1122_v26 = vmul.f32 1.442695, %v2359_v0  ;;  %1164 = vadd.xlane.f32.xlu0 %v1354_v4 }
 0x33a   :  { %v1050_v2 = vpop.xlane.xlu0 %1049 }
 0x33b   :  { %1361 = vpow2.f32 %v1122_v26  ;;  %v2363_v5 = vsub.f32 %v2251_v12, %v1050_v2 }
 0x33c   :  { %v1356_v62 = vpop.eup %1355 }
 0x33d   :  { %v1124_v29 = vmul.f32 1.442695, %v2363_v5  ;;  %1166 = vadd.xlane.f32.xlu1 %v1356_v62 }
 0x33e   :  { %v1052_v8 = vpop.xlane.xlu1 %1051 }
 0x33f   :  { %1363 = vpow2.f32 %v1124_v29  ;;  %v2367_v9 = vsub.f32 %v2259_v16, %v1052_v8 }
 0x340   :  { %v1358_v11 = vpop.eup %1357 }
 0x341   :  { %v1126_v33 = vmul.f32 1.442695, %v2367_v9  ;;  %1168 = vadd.xlane.f32.xlu0 %v1358_v11 }
 0x342   :  { %v1054_v55 = vpop.xlane.xlu0 %1053 }
 0x343   :  { %1365 = vpow2.f32 %v1126_v33  ;;  %v2371_v14 = vsub.f32 %v2267_v21, %v1054_v55 }
 0x344   :  { %v1360_v12 = vpop.eup %1359 }
 0x345   :  { %v1128_v36 = vmul.f32 1.442695, %v2371_v14  ;;  %1170 = vadd.xlane.f32.xlu1 %v1360_v12 }
 0x347   :  { %1367 = vpow2.f32 %v1128_v36 }
 0x348   :  { %v1362_v17 = vpop.eup %1361 }
 0x349   :  { %1172 = vadd.xlane.f32.xlu0 %v1362_v17 }
 0x34c   :  { %v1364_v19 = vpop.eup %1363 }
 0x34d   :  { %1174 = vadd.xlane.f32.xlu1 %v1364_v19 }
 0x350   :  { %v1366_v16 = vpop.eup %1365 }
 0x351   :  { %1176 = vadd.xlane.f32.xlu0 %v1366_v16 }
 0x354   :  { %v1368_v39 = vpop.eup %1367 }
 0x355   :  { %1178 = vadd.xlane.f32.xlu1 %v1368_v39 }
 0x37e   :  { %v1131_v20 = vpop.xlane.xlu1 %1130 }
 0x37f   :  { %1369 = vlog2.f32 %v1131_v20 }
 0x382   :  { %v1133_v25 = vpop.xlane.xlu0 %1132 }
 0x383   :  { %1371 = vlog2.f32 %v1133_v25 }
 0x386   :  { %v1135_v47 = vpop.xlane.xlu1 %1134 }
 0x387   :  { %1373 = vlog2.f32 %v1135_v47 }
 0x38a   :  { %v1137_v21 = vpop.xlane.xlu0 %1136 }
 0x38b   :  { %1375 = vlog2.f32 %v1137_v21 }
 0x38c   :  { %v1370_v32 = vpop.eup %1369 }
 0x38d   :  { %v1181_v30 = vmul.f32 0.6931472, %v1370_v32 }
 0x38e   :  { %v1139_v51 = vpop.xlane.xlu1 %1138 }
 0x38f   :  { %v1230_v35 = vsub.f32 %v2275_v24, %v1181_v30  ;;  %1377 = vlog2.f32 %v1139_v51 }
 0x390   :  { %v1372_v37 = vpop.eup %1371 }
 0x391   :  { %1255 = vst [vmem:[%s2482_s8] sm:$0xff] %v1230_v35  ;;  %v1183_v54 = vmul.f32 0.6931472, %v1372_v37 }
 0x392   :  { %v1141_v41 = vpop.xlane.xlu0 %1140 }
 0x393   :  { %v1231_v44 = vsub.f32 %v2279_v28, %v1183_v54  ;;  %1379 = vlog2.f32 %v1141_v41 }
 0x394   :  { %v1374_v58 = vpop.eup %1373 }
 0x395   :  { %1256 = vst [vmem:[%s2482_s8 + $0x8] sm:$0xff] %v1231_v44  ;;  %v1185_v48 = vmul.f32 0.6931472, %v1374_v58 }
 0x396   :  { %v1143_v15 = vpop.xlane.xlu1 %1142 }
 0x397   :  { %v1232_v24 = vsub.f32 %v2283_v31, %v1185_v48  ;;  %1381 = vlog2.f32 %v1143_v15 }
 0x398   :  { %v1376_v45 = vpop.eup %1375 }
 0x399   :  { %1257 = vst [vmem:[%s2482_s8 + $0x10] sm:$0xff] %v1232_v24  ;;  %v1187_v18 = vmul.f32 0.6931472, %v1376_v45 }
 0x39a   :  { %v1145_v56 = vpop.xlane.xlu0 %1144 }
 0x39b   :  { %v1233_v28 = vsub.f32 %v2287_v10, %v1187_v18  ;;  %1383 = vlog2.f32 %v1145_v56 }
 0x39c   :  { %v1378_v61 = vpop.eup %1377 }
 0x39d   :  { %1258 = vst [vmem:[%s2482_s8 + $0x18] sm:$0xff] %v1233_v28  ;;  %v1189_v22 = vmul.f32 0.6931472, %v1378_v61 }
 0x39e   :  { %v1147_v40 = vpop.xlane.xlu1 %1146 }
 0x39f   :  { %v1234_v31 = vsub.f32 %v2291_v46, %v1189_v22  ;;  %1385 = vlog2.f32 %v1147_v40 }
 0x3a0   :  { %v1380_v1 = vpop.eup %1379 }
 0x3a1   :  { %1259 = vst [vmem:[%s2482_s8 + $0x20] sm:$0xff] %v1234_v31  ;;  %v1191_v3 = vmul.f32 0.6931472, %v1380_v1 }
 0x3a2   :  { %v1149_v63 = vpop.xlane.xlu0 %1148 }
 0x3a3   :  { %v1235_v10 = vsub.f32 %v2295_v50, %v1191_v3  ;;  %1387 = vlog2.f32 %v1149_v63 }
 0x3a4   :  { %v1382_v4 = vpop.eup %1381 }
 0x3a5   :  { %1260 = vst [vmem:[%s2482_s8 + $0x28] sm:$0xff] %v1235_v10  ;;  %v1193_v26 = vmul.f32 0.6931472, %v1382_v4 }
 0x3a6   :  { %v1151_v2 = vpop.xlane.xlu1 %1150 }
 0x3a7   :  { %v1236_v46 = vsub.f32 %v2299_v53, %v1193_v26  ;;  %1389 = vlog2.f32 %v1151_v2 }
 0x3a8   :  { %v1384_v62 = vpop.eup %1383 }
 0x3a9   :  { %1261 = vst [vmem:[%s2482_s8 + $0x30] sm:$0xff] %v1236_v46  ;;  %v1195_v29 = vmul.f32 0.6931472, %v1384_v62 }
 0x3aa   :  { %v1153_v8 = vpop.xlane.xlu0 %1152 }
 0x3ab   :  { %v1237_v50 = vsub.f32 %v2303_v43, %v1195_v29  ;;  %1391 = vlog2.f32 %v1153_v8 }
 0x3ac   :  { %v1386_v11 = vpop.eup %1385 }
 0x3ad   :  { %1262 = vst [vmem:[%s2482_s8 + $0x38] sm:$0xff] %v1237_v50  ;;  %v1197_v33 = vmul.f32 0.6931472, %v1386_v11 }
 0x3ae   :  { %v1155_v55 = vpop.xlane.xlu1 %1154 }
 0x3af   :  { %v1238_v53 = vsub.f32 %v2307_v60, %v1197_v33  ;;  %1393 = vlog2.f32 %v1155_v55 }
 0x3b0   :  { %v1388_v12 = vpop.eup %1387 }
 0x3b1   :  { %1263 = vst [vmem:[%s2482_s8 + $0x40] sm:$0xff] %v1238_v53  ;;  %v1199_v36 = vmul.f32 0.6931472, %v1388_v12 }
 0x3b2   :  { %v1157_v17 = vpop.xlane.xlu0 %1156 }
 0x3b3   :  { %v1239_v43 = vsub.f32 %v2311_v42, %v1199_v36  ;;  %1395 = vlog2.f32 %v1157_v17 }
 0x3b4   :  { %v1390_v19 = vpop.eup %1389 }
 0x3b5   :  { %1264 = vst [vmem:[%s2482_s8 + $0x48] sm:$0xff] %v1239_v43  ;;  %v1201_v16 = vmul.f32 0.6931472, %v1390_v19 }
 0x3b6   :  { %v1159_v39 = vpop.xlane.xlu1 %1158 }
 0x3b7   :  { %v1240_v60 = vsub.f32 %v2315_v7, %v1201_v16  ;;  %1397 = vlog2.f32 %v1159_v39 }
 0x3b8   :  { %v1392_v20 = vpop.eup %1391 }
 0x3b9   :  { %1265 = vst [vmem:[%s2482_s8 + $0x50] sm:$0xff] %v1240_v60  ;;  %v1203_v25 = vmul.f32 0.6931472, %v1392_v20 }
 0x3ba   :  { %v1161_v47 = vpop.xlane.xlu0 %1160 }
 0x3bb   :  { %v1241_v42 = vsub.f32 %v2319_v49, %v1203_v25  ;;  %1399 = vlog2.f32 %v1161_v47 }
 0x3bc   :  { %v1394_v21 = vpop.eup %1393 }
 0x3bd   :  { %1266 = vst [vmem:[%s2482_s8 + $0x58] sm:$0xff] %v1241_v42  ;;  %v1205_v32 = vmul.f32 0.6931472, %v1394_v21 }
 0x3be   :  { %v1163_v30 = vpop.xlane.xlu1 %1162 }
 0x3bf   :  { %v1242_v7 = vsub.f32 %v2323_v6, %v1205_v32  ;;  %1401 = vlog2.f32 %v1163_v30 }
 0x3c0   :  { %v1396_v51 = vpop.eup %1395 }
 0x3c1   :  { %1267 = vst [vmem:[%s2482_s8 + $0x60] sm:$0xff] %v1242_v7  ;;  %v1207_v35 = vmul.f32 0.6931472, %v1396_v51 }
 0x3c2   :  { %v1165_v37 = vpop.xlane.xlu0 %1164 }
 0x3c3   :  { %v1243_v49 = vsub.f32 %v2327_v23, %v1207_v35  ;;  %1403 = vlog2.f32 %v1165_v37 }
 0x3c4   :  { %v1398_v54 = vpop.eup %1397 }
 0x3c5   :  { %1268 = vst [vmem:[%s2482_s8 + $0x68] sm:$0xff] %v1243_v49  ;;  %v1209_v41 = vmul.f32 0.6931472, %v1398_v54 }
 0x3c6   :  { %v1167_v44 = vpop.xlane.xlu1 %1166 }
 0x3c7   :  { %v1244_v6 = vsub.f32 %v2331_v27, %v1209_v41  ;;  %1405 = vlog2.f32 %v1167_v44 }
 0x3c8   :  { %v1400_v58 = vpop.eup %1399 }
 0x3c9   :  { %1269 = vst [vmem:[%s2482_s8 + $0x70] sm:$0xff] %v1244_v6  ;;  %v1211_v48 = vmul.f32 0.6931472, %v1400_v58 }
 0x3ca   :  { %v1169_v15 = vpop.xlane.xlu0 %1168 }
 0x3cb   :  { %v1245_v23 = vsub.f32 %v2335_v34, %v1211_v48  ;;  %1407 = vlog2.f32 %v1169_v15 }
 0x3cc   :  { %v1402_v24 = vpop.eup %1401 }
 0x3cd   :  { %1270 = vst [vmem:[%s2482_s8 + $0x78] sm:$0xff] %v1245_v23  ;;  %v1213_v45 = vmul.f32 0.6931472, %v1402_v24 }
 0x3ce   :  { %v1171_v18 = vpop.xlane.xlu1 %1170 }
 0x3cf   :  { %v1246_v27 = vsub.f32 %v2339_v38, %v1213_v45  ;;  %1409 = vlog2.f32 %v1171_v18 }
 0x3d0   :  { %v1404_v56 = vpop.eup %1403 }
 0x3d1   :  { %1271 = vst [vmem:[%s2482_s8 + $0x80] sm:$0xff] %v1246_v27  ;;  %v1215_v28 = vmul.f32 0.6931472, %v1404_v56 }
 0x3d2   :  { %v1173_v61 = vpop.xlane.xlu0 %1172 }
 0x3d3   :  { %v1247_v34 = vsub.f32 %v2343_v13, %v1215_v28  ;;  %1411 = vlog2.f32 %v1173_v61 }
 0x3d4   :  { %v1406_v22 = vpop.eup %1405 }
 0x3d5   :  { %1272 = vst [vmem:[%s2482_s8 + $0x88] sm:$0xff] %v1247_v34  ;;  %v1217_v40 = vmul.f32 0.6931472, %v1406_v22 }
 0x3d6   :  { %v1175_v31 = vpop.xlane.xlu1 %1174 }
 0x3d7   :  { %v1248_v38 = vsub.f32 %v2347_v52, %v1217_v40  ;;  %1413 = vlog2.f32 %v1175_v31 }
 0x3d8   :  { %v1408_v1 = vpop.eup %1407 }
 0x3d9   :  { %1273 = vst [vmem:[%s2482_s8 + $0x90] sm:$0xff] %v1248_v38  ;;  %v1219_v3 = vmul.f32 0.6931472, %v1408_v1 }
 0x3da   :  { %v1177_v63 = vpop.xlane.xlu0 %1176 }
 0x3db   :  { %v1249_v13 = vsub.f32 %v2351_v57, %v1219_v3  ;;  %1415 = vlog2.f32 %v1177_v63 }
 0x3dc   :  { %v1410_v10 = vpop.eup %1409 }
 0x3dd   :  { %1274 = vst [vmem:[%s2482_s8 + $0x98] sm:$0xff] %v1249_v13  ;;  %v1221_v4 = vmul.f32 0.6931472, %v1410_v10 }
 0x3de   :  { %v1179_v26 = vpop.xlane.xlu1 %1178 }
 0x3df   :  { %v1250_v52 = vsub.f32 %v2355_v59, %v1221_v4  ;;  %1417 = vlog2.f32 %v1179_v26 }
 0x3e0   :  { %v1412_v2 = vpop.eup %1411 }
 0x3e1   :  { %1275 = vst [vmem:[%s2482_s8 + $0xa0] sm:$0xff] %v1250_v52  ;;  %v1223_v46 = vmul.f32 0.6931472, %v1412_v2 }
 0x3e3   :  { %v1251_v62 = vsub.f32 %v2359_v0, %v1223_v46 }
 0x3e4   :  { %v1414_v57 = vpop.eup %1413 }
 0x3e5   :  { %1276 = vst [vmem:[%s2482_s8 + $0xa8] sm:$0xff] %v1251_v62  ;;  %v1225_v29 = vmul.f32 0.6931472, %v1414_v57 }
 0x3e7   :  { %v1252_v8 = vsub.f32 %v2363_v5, %v1225_v29 }
 0x3e8   :  { %v1416_v50 = vpop.eup %1415 }
 0x3e9   :  { %1277 = vst [vmem:[%s2482_s8 + $0xb0] sm:$0xff] %v1252_v8  ;;  %v1227_v59 = vmul.f32 0.6931472, %v1416_v50 }
 0x3eb   :  { %v1253_v11 = vsub.f32 %v2367_v9, %v1227_v59 }
 0x3ec   :  { %v1418_v33 = vpop.eup %1417 }
 0x3ed   :  { %1278 = vst [vmem:[%s2482_s8 + $0xb8] sm:$0xff] %v1253_v11  ;;  %v1229_v0 = vmul.f32 0.6931472, %v1418_v33 }
 0x3ef   :  { %v1254_v55 = vsub.f32 %v2371_v14, %v1229_v0 }
 0x3f1   :  { %1279 = vst [vmem:[%s2482_s8 + $0xc0] sm:$0xff] %v1254_v55 }

</bundles_post_ra>
